<compile_context>
chip_gen: v7x
topology: tpu7x:2x2x1
jax: 0.10.0
libtpu: 0.0.40
codegen_flags: <defaults>
</compile_context>

<pallas_src>
import functools

import jax
import jax.numpy as jnp
from jax.experimental import pallas as pl
from jax.experimental.pallas import tpu as pltpu


# ----------------------------------------------------------------------------
# Fused Encoder kernel.
# ----------------------------------------------------------------------------
def _encoder_kernel(x_ref, wx_ref, whh_ref, bx_ref,
                    wpe_ref, bpe_ref, w1a_ref, w1b_ref, b1_ref, w2_ref, b2_ref,
                    wf1a_ref, wf1b_ref, bf1_ref, wf2_ref, bf2_ref,
                    dfi_ref, stats_ref,
                    xg_sc, pool_sc,
                    *, T, B, H, zS, groups):
    # ---------------- LSTM ----------------
    # Input projections for all T steps in one MXU matmul (spatial embedding
    # already folded into wx / bx in the wrapper).
    x = x_ref[...]                                                   # (T*B, 2)
    xg = jnp.dot(x, wx_ref[...],
                 preferred_element_type=jnp.float32) + bx_ref[...]   # (T*B, 4H)
    xg_sc[...] = xg

    whh = whh_ref[...]                                               # (H, 4H)

    def step(t, carry):
        h, c = carry
        row = pl.multiple_of(t * B, B)
        gates = xg_sc[pl.ds(row, B), :] + jnp.dot(
            h, whh, preferred_element_type=jnp.float32)              # (B, 4H)
        # Gate order follows PyTorch nn.LSTM: [i, f, g, o].
        # NOTE: at toy H the gate slices are sub-128-lane; for production H
        # pad H so the 4H slices land on lane boundaries.
        i = jax.nn.sigmoid(gates[:, 0 * H:1 * H])
        f = jax.nn.sigmoid(gates[:, 1 * H:2 * H])
        g = jnp.tanh(gates[:, 2 * H:3 * H])
        o = jax.nn.sigmoid(gates[:, 3 * H:4 * H])
        c_new = f * c + i * g
        h_new = o * jnp.tanh(c_new)
        return (h_new, c_new)

    h0 = jnp.zeros((B, H), jnp.float32)
    c0 = jnp.zeros((B, H), jnp.float32)
    final_h, _ = jax.lax.fori_loop(0, T, step, (h0, c0), unroll=True)

    # ---------------- PoolHiddenNet ----------------
    # Row r = i*n + j of the PyTorch formulation:
    #   Linear([emb(pos_j - pos_i), h_j]) = A[j] - Bm[i]
    # A / Bm are per-row quantities -> compute once for the whole batch.
    end_pos = x[(T - 1) * B:, :]                                     # (B, 2)
    pe = jnp.dot(end_pos, wpe_ref[...], preferred_element_type=jnp.float32)
    A = (jnp.dot(pe + bpe_ref[...], w1a_ref[...],
                 preferred_element_type=jnp.float32)
         + jnp.dot(final_h, w1b_ref[...], preferred_element_type=jnp.float32)
         + b1_ref[...])                                              # (B, 512) by j
    Bm = jnp.dot(pe, w1a_ref[...], preferred_element_type=jnp.float32)  # by i

    w2 = w2_ref[...]
    b2 = b2_ref[...]
    P = w2.shape[1]
    hid1 = A.shape[1]
    for (s, e) in groups:                        # static group boundaries
        n = e - s
        # (n, n, 512): element [i, j, :] = A[j] - Bm[i]
        h1 = jnp.maximum(A[None, s:e, :] - Bm[s:e, None, :], 0.0)
        h2 = jnp.dot(h1.reshape(n * n, hid1), w2,
                     preferred_element_type=jnp.float32) + b2        # (n*n, P)
        h2 = jnp.maximum(h2, 0.0).reshape(n, n, P)
        pool_sc[s:e, :] = jnp.max(h2, axis=1)                        # max over j

    pool_h = pool_sc[...]                                            # (B, P)

    # ---------------- fc head ----------------
    # concat([final_h, pool_h]) @ Wf1  ==  final_h @ Wf1a + pool_h @ Wf1b
    f1 = jnp.maximum(
        jnp.dot(final_h, wf1a_ref[...], preferred_element_type=jnp.float32)
        + jnp.dot(pool_h, wf1b_ref[...], preferred_element_type=jnp.float32)
        + bf1_ref[...], 0.0)
    y = jnp.maximum(
        jnp.dot(f1, wf2_ref[...], preferred_element_type=jnp.float32)
        + bf2_ref[...], 0.0)                                         # (B, 2*zS)

    # ---------------- outputs ----------------
    dfi_ref[:, :H] = final_h
    dfi_ref[:, H:] = pool_h
    # Single lane-contiguous (B, 2*zS) store: [mu | std], std = exp(0.5*logvar)
    col = jax.lax.broadcasted_iota(jnp.int32, (B, 2 * zS), 1)
    stats_ref[...] = jnp.where(col < zS, y, jnp.exp(0.5 * y))


# ----------------------------------------------------------------------------
# Wrapper: weight folding / splitting + single pallas_call.
# ----------------------------------------------------------------------------
def encoder_forward(rel_traj, seq_start_end, p):
    """rel_traj: (T, B, 2); seq_start_end: static list of (start, end)."""
    T, B, _ = rel_traj.shape
    E = p["W_pe"].shape[1]
    H = p["W_hh"].shape[0]
    P = p["W2"].shape[1]
    zS = p["zS"]

    # Fold spatial embedding into LSTM input weights (exact identity).
    wx = jnp.dot(p["W_spe"], p["W_ih"])                              # (2, 4H)
    bx = (jnp.dot(p["b_spe"], p["W_ih"]) + p["b_lstm"]).reshape(1, 4 * H)

    # Split pool layer-1 weight into rel-emb / hidden halves.
    w1a, w1b = p["W1"][:E, :], p["W1"][E:, :]
    # Split fc layer-1 weight into final_h / pool_h halves (folds the concat).
    wf1a, wf1b = p["Wf1"][:H, :], p["Wf1"][H:, :]

    groups = tuple((int(s), int(e)) for (s, e) in seq_start_end)
    kernel = functools.partial(_encoder_kernel, T=T, B=B, H=H, zS=zS,
                               groups=groups)

    dfi, stats = pl.pallas_call(
        kernel,
        out_shape=(
            jax.ShapeDtypeStruct((B, H + P), jnp.float32),
            jax.ShapeDtypeStruct((B, 2 * zS), jnp.float32),
        ),
        scratch_shapes=[
            pltpu.VMEM((T * B, 4 * H), jnp.float32),  # precomputed input gates
            pltpu.VMEM((B, P), jnp.float32),          # pooled features
        ],
    )(rel_traj.reshape(T * B, 2), wx, p["W_hh"], bx,
      p["W_pe"], p["b_pe"].reshape(1, -1), w1a, w1b, p["b1"].reshape(1, -1),
      p["W2"], p["b2"].reshape(1, -1),
      wf1a, wf1b, p["bf1"].reshape(1, -1), p["Wf2"], p["bf2"].reshape(1, -1))

    return dfi, stats[:, :zS], stats[:, zS:]


# ----------------------------------------------------------------------------
# Pure-JAX reference (mirrors the PyTorch code) for a correctness check.
# ----------------------------------------------------------------------------
def encoder_reference(rel_traj, seq_start_end, p):
    T, B, _ = rel_traj.shape
    E = p["W_pe"].shape[1]
    H = p["W_hh"].shape[0]
    zS = p["zS"]
    emb = (rel_traj.reshape(-1, 2) @ p["W_spe"] + p["b_spe"]).reshape(T, B, E)
    h = jnp.zeros((B, H), jnp.float32)
    c = jnp.zeros((B, H), jnp.float32)
    for t in range(T):
        gates = emb[t] @ p["W_ih"] + h @ p["W_hh"] + p["b_lstm"]
        i = jax.nn.sigmoid(gates[:, :H])
        f = jax.nn.sigmoid(gates[:, H:2 * H])
        g = jnp.tanh(gates[:, 2 * H:3 * H])
        o = jax.nn.sigmoid(gates[:, 3 * H:])
        c = f * c + i * g
        h = o * jnp.tanh(c)
    final_h = h
    end_pos = rel_traj[-1]
    pools = []
    for (s, e) in seq_start_end:
        n = e - s
        hid = final_h[s:e]
        pos = end_pos[s:e]
        hid1 = jnp.tile(hid, (n, 1))
        pos1 = jnp.tile(pos, (n, 1))
        pos2 = jnp.repeat(pos, n, axis=0)
        rel_emb = (pos1 - pos2) @ p["W_pe"] + p["b_pe"]
        inp = jnp.concatenate([rel_emb, hid1], axis=1)
        h1 = jnp.maximum(inp @ p["W1"] + p["b1"], 0.0)
        h2 = jnp.maximum(h1 @ p["W2"] + p["b2"], 0.0)
        pools.append(h2.reshape(n, n, -1).max(axis=1))
    pool_h = jnp.concatenate(pools, axis=0)
    dfi = jnp.concatenate([final_h, pool_h], axis=1)
    f1 = jnp.maximum(dfi @ p["Wf1"] + p["bf1"], 0.0)
    stats = jnp.maximum(f1 @ p["Wf2"] + p["bf2"], 0.0)
    return dfi, stats[:, :zS], jnp.sqrt(jnp.exp(stats[:, zS:]))


# ----------------------------------------------------------------------------
# Deterministic parameter init (uniform +-1/sqrt(fan_in), like torch defaults).
# ----------------------------------------------------------------------------
def init_params(key, *, embedding_dim, enc_h_dim, mlp_dim, pool_dim, zS_dim):
    E, H, P = embedding_dim, enc_h_dim, pool_dim
    keys = iter(jax.random.split(key, 32))

    def u(shape, fan_in):
        k = float(fan_in) ** -0.5
        return jax.random.uniform(next(keys), shape, jnp.float32, -k, k)

    return {
        "zS": zS_dim,
        # Encoder.spatial_embedding : Linear(2, E)
        "W_spe": u((2, E), 2), "b_spe": u((E,), 2),
        # nn.LSTM(E, H, 1)  (combined bias = b_ih + b_hh)
        "W_ih": u((E, 4 * H), H), "W_hh": u((H, 4 * H), H), "b_lstm": u((4 * H,), H),
        # PoolHiddenNet.spatial_embedding : Linear(2, E)
        "W_pe": u((2, E), 2), "b_pe": u((E,), 2),
        # PoolHiddenNet.mlp_pre_pool : [E+H, 512, P], batch_norm=False
        "W1": u((E + H, 512), E + H), "b1": u((512,), E + H),
        "W2": u((512, P), 512), "b2": u((P,), 512),
        # Encoder.fc : [H+P, mlp_dim, 2*zS], batch_norm=False
        "Wf1": u((H + P, mlp_dim), H + P), "bf1": u((mlp_dim,), H + P),
        "Wf2": u((mlp_dim, 2 * zS_dim), mlp_dim), "bf2": u((2 * zS_dim,), mlp_dim),
    }


if __name__ == "__main__":
    # Small shapes consistent with Encoder.forward: rel_traj (obs_len, batch, 2)
    obs_len, batch = 8, 4
    embedding_dim, enc_h_dim, mlp_dim, pool_dim, zS_dim = 16, 16, 32, 32, 8
    seq_start_end = [(0, 2), (2, 4)]  # static group boundaries

    key = jax.random.PRNGKey(0)
    k_data, k_par = jax.random.split(key)
    rel_traj = jax.random.normal(k_data, (obs_len, batch, 2), dtype=jnp.float32)
    params = init_params(k_par, embedding_dim=embedding_dim, enc_h_dim=enc_h_dim,
                         mlp_dim=mlp_dim, pool_dim=pool_dim, zS_dim=zS_dim)

    dist_fc_input, mu, std = encoder_forward(rel_traj, seq_start_end, params)
    jax.block_until_ready((dist_fc_input, mu, std))

    with jax.default_matmul_precision("highest"):
        ref = encoder_reference(rel_traj, seq_start_end, params)
    ref = jax.block_until_ready(ref)

    for got, want, name in zip((dist_fc_input, mu, std), ref,
                               ("dist_fc_input", "mu", "std")):
        assert got.shape == want.shape, (name, got.shape, want.shape)
        assert jnp.allclose(got, want, rtol=5e-3, atol=5e-3), name

    print("KERNEL_OK")
</pallas_src>

<mosaic_0001>
module attributes {stable_mosaic.version = 11 : i64} {
  func.func @_encoder_kernel(%arg0: memref<32x2xf32, #tpu.memory_space<vmem>>, %arg1: memref<2x64xf32, #tpu.memory_space<vmem>>, %arg2: memref<16x64xf32, #tpu.memory_space<vmem>>, %arg3: memref<1x64xf32, #tpu.memory_space<vmem>>, %arg4: memref<2x16xf32, #tpu.memory_space<vmem>>, %arg5: memref<1x16xf32, #tpu.memory_space<vmem>>, %arg6: memref<16x512xf32, #tpu.memory_space<vmem>>, %arg7: memref<16x512xf32, #tpu.memory_space<vmem>>, %arg8: memref<1x512xf32, #tpu.memory_space<vmem>>, %arg9: memref<512x32xf32, #tpu.memory_space<vmem>>, %arg10: memref<1x32xf32, #tpu.memory_space<vmem>>, %arg11: memref<16x32xf32, #tpu.memory_space<vmem>>, %arg12: memref<32x32xf32, #tpu.memory_space<vmem>>, %arg13: memref<1x32xf32, #tpu.memory_space<vmem>>, %arg14: memref<32x16xf32, #tpu.memory_space<vmem>>, %arg15: memref<1x16xf32, #tpu.memory_space<vmem>>, %arg16: memref<4x48xf32, #tpu.memory_space<vmem>>, %arg17: memref<4x16xf32, #tpu.memory_space<vmem>>, %arg18: memref<32x64xf32, #tpu.memory_space<vmem>>, %arg19: memref<4x32xf32, #tpu.memory_space<vmem>>) attributes {dimension_semantics = [], scalar_prefetch = 0 : i64, scratch_operands = 2 : i64, tpu.core_type = #tpu.core_type<tc>} {
    %c0 = arith.constant 0 : index
    %c0_0 = arith.constant 0 : index
    %0 = vector.load %arg0[%c0, %c0_0] : memref<32x2xf32, #tpu.memory_space<vmem>>, vector<32x2xf32>
    %c0_1 = arith.constant 0 : index
    %c0_2 = arith.constant 0 : index
    %1 = vector.load %arg1[%c0_1, %c0_2] : memref<2x64xf32, #tpu.memory_space<vmem>>, vector<2x64xf32>
    %cst = arith.constant dense<0.000000e+00> : vector<32x64xf32>
    %2 = tpu.matmul %0, %1, %cst {dimension_numbers = #tpu.dot_dimension_numbers<[1], [0], [0], [1], [0, 0, 1, 1], [], []>} : vector<32x2xf32>, vector<2x64xf32>, vector<32x64xf32> -> vector<32x64xf32>
    %c0_3 = arith.constant 0 : index
    %c0_4 = arith.constant 0 : index
    %3 = vector.load %arg3[%c0_3, %c0_4] : memref<1x64xf32, #tpu.memory_space<vmem>>, vector<1x64xf32>
    %4 = vector.broadcast %3 : vector<1x64xf32> to vector<32x64xf32>
    %5 = arith.addf %2, %4 : vector<32x64xf32>
    %c0_5 = arith.constant 0 : index
    %c0_6 = arith.constant 0 : index
    %6 = vector.load %arg18[%c0_5, %c0_6] : memref<32x64xf32, #tpu.memory_space<vmem>>, vector<32x64xf32>
    tpu.vector_store %arg18[%c0_5, %c0_6], %5 {strides = array<i32>} : memref<32x64xf32, #tpu.memory_space<vmem>>, vector<32x64xf32>,
    %c0_7 = arith.constant 0 : index
    %c0_8 = arith.constant 0 : index
    %7 = vector.load %arg2[%c0_7, %c0_8] : memref<16x64xf32, #tpu.memory_space<vmem>>, vector<16x64xf32>
    %cst_9 = arith.constant 0.000000e+00 : f32
    %8 = vector.broadcast %cst_9 : f32 to vector<4x16xf32>
    %cst_10 = arith.constant 0.000000e+00 : f32
    %9 = vector.broadcast %cst_10 : f32 to vector<4x16xf32>
    %c0_i32 = arith.constant 0 : i32
    %c4_i32 = arith.constant 4 : i32
    %10 = arith.muli %c0_i32, %c4_i32 : i32
    %11 = tpu.assume_multiple %10, 4 : i32
    %12 = arith.index_cast %11 : i32 to index
    %c0_11 = arith.constant 0 : index
    %13 = vector.load %arg18[%12, %c0_11] : memref<32x64xf32, #tpu.memory_space<vmem>>, vector<4x64xf32>
    %cst_12 = arith.constant dense<0.000000e+00> : vector<4x64xf32>
    %14 = tpu.matmul %8, %7, %cst_12 {dimension_numbers = #tpu.dot_dimension_numbers<[1], [0], [0], [1], [0, 0, 1, 1], [], []>} : vector<4x16xf32>, vector<16x64xf32>, vector<4x64xf32> -> vector<4x64xf32>
    %15 = arith.addf %13, %14 : vector<4x64xf32>
    %16 = vector.extract_strided_slice %15 {offsets = [0, 0], sizes = [4, 16], strides = [1, 1]} : vector<4x64xf32> to vector<4x16xf32>
    %17 = arith.negf %16 : vector<4x16xf32>
    %18 = math.exp %17 : vector<4x16xf32>
    %cst_13 = arith.constant 1.000000e+00 : f32
    %19 = vector.broadcast %cst_13 : f32 to vector<4x16xf32>
    %20 = arith.addf %19, %18 : vector<4x16xf32>
    %21 = arith.divf %19, %20 : vector<4x16xf32>
    %22 = vector.extract_strided_slice %15 {offsets = [0, 16], sizes = [4, 16], strides = [1, 1]} : vector<4x64xf32> to vector<4x16xf32>
    %23 = arith.negf %22 : vector<4x16xf32>
    %24 = math.exp %23 : vector<4x16xf32>
    %cst_14 = arith.constant 1.000000e+00 : f32
    %25 = vector.broadcast %cst_14 : f32 to vector<4x16xf32>
    %26 = arith.addf %25, %24 : vector<4x16xf32>
    %27 = arith.divf %25, %26 : vector<4x16xf32>
    %28 = vector.extract_strided_slice %15 {offsets = [0, 32], sizes = [4, 16], strides = [1, 1]} : vector<4x64xf32> to vector<4x16xf32>
    %29 = math.tanh %28 : vector<4x16xf32>
    %30 = vector.extract_strided_slice %15 {offsets = [0, 48], sizes = [4, 16], strides = [1, 1]} : vector<4x64xf32> to vector<4x16xf32>
    %31 = arith.negf %30 : vector<4x16xf32>
    %32 = math.exp %31 : vector<4x16xf32>
    %cst_15 = arith.constant 1.000000e+00 : f32
    %33 = vector.broadcast %cst_15 : f32 to vector<4x16xf32>
    %34 = arith.addf %33, %32 : vector<4x16xf32>
    %35 = arith.divf %33, %34 : vector<4x16xf32>
    %36 = arith.mulf %27, %9 : vector<4x16xf32>
    %37 = arith.mulf %21, %29 : vector<4x16xf32>
    %38 = arith.addf %36, %37 : vector<4x16xf32>
    %39 = math.tanh %38 : vector<4x16xf32>
    %40 = arith.mulf %35, %39 : vector<4x16xf32>
    %c1_i32 = arith.constant 1 : i32
    %c4_i32_16 = arith.constant 4 : i32
    %41 = arith.muli %c1_i32, %c4_i32_16 : i32
    %42 = tpu.assume_multiple %41, 4 : i32
    %43 = arith.index_cast %42 : i32 to index
    %c0_17 = arith.constant 0 : index
    %44 = vector.load %arg18[%43, %c0_17] : memref<32x64xf32, #tpu.memory_space<vmem>>, vector<4x64xf32>
    %cst_18 = arith.constant dense<0.000000e+00> : vector<4x64xf32>
    %45 = tpu.matmul %40, %7, %cst_18 {dimension_numbers = #tpu.dot_dimension_numbers<[1], [0], [0], [1], [0, 0, 1, 1], [], []>} : vector<4x16xf32>, vector<16x64xf32>, vector<4x64xf32> -> vector<4x64xf32>
    %46 = arith.addf %44, %45 : vector<4x64xf32>
    %47 = vector.extract_strided_slice %46 {offsets = [0, 0], sizes = [4, 16], strides = [1, 1]} : vector<4x64xf32> to vector<4x16xf32>
    %48 = arith.negf %47 : vector<4x16xf32>
    %49 = math.exp %48 : vector<4x16xf32>
    %cst_19 = arith.constant 1.000000e+00 : f32
    %50 = vector.broadcast %cst_19 : f32 to vector<4x16xf32>
    %51 = arith.addf %50, %49 : vector<4x16xf32>
    %52 = arith.divf %50, %51 : vector<4x16xf32>
    %53 = vector.extract_strided_slice %46 {offsets = [0, 16], sizes = [4, 16], strides = [1, 1]} : vector<4x64xf32> to vector<4x16xf32>
    %54 = arith.negf %53 : vector<4x16xf32>
    %55 = math.exp %54 : vector<4x16xf32>
    %cst_20 = arith.constant 1.000000e+00 : f32
    %56 = vector.broadcast %cst_20 : f32 to vector<4x16xf32>
    %57 = arith.addf %56, %55 : vector<4x16xf32>
    %58 = arith.divf %56, %57 : vector<4x16xf32>
    %59 = vector.extract_strided_slice %46 {offsets = [0, 32], sizes = [4, 16], strides = [1, 1]} : vector<4x64xf32> to vector<4x16xf32>
    %60 = math.tanh %59 : vector<4x16xf32>
    %61 = vector.extract_strided_slice %46 {offsets = [0, 48], sizes = [4, 16], strides = [1, 1]} : vector<4x64xf32> to vector<4x16xf32>
    %62 = arith.negf %61 : vector<4x16xf32>
    %63 = math.exp %62 : vector<4x16xf32>
    %cst_21 = arith.constant 1.000000e+00 : f32
    %64 = vector.broadcast %cst_21 : f32 to vector<4x16xf32>
    %65 = arith.addf %64, %63 : vector<4x16xf32>
    %66 = arith.divf %64, %65 : vector<4x16xf32>
    %67 = arith.mulf %58, %38 : vector<4x16xf32>
    %68 = arith.mulf %52, %60 : vector<4x16xf32>
    %69 = arith.addf %67, %68 : vector<4x16xf32>
    %70 = math.tanh %69 : vector<4x16xf32>
    %71 = arith.mulf %66, %70 : vector<4x16xf32>
    %c2_i32 = arith.constant 2 : i32
    %c4_i32_22 = arith.constant 4 : i32
    %72 = arith.muli %c2_i32, %c4_i32_22 : i32
    %73 = tpu.assume_multiple %72, 4 : i32
    %74 = arith.index_cast %73 : i32 to index
    %c0_23 = arith.constant 0 : index
    %75 = vector.load %arg18[%74, %c0_23] : memref<32x64xf32, #tpu.memory_space<vmem>>, vector<4x64xf32>
    %cst_24 = arith.constant dense<0.000000e+00> : vector<4x64xf32>
    %76 = tpu.matmul %71, %7, %cst_24 {dimension_numbers = #tpu.dot_dimension_numbers<[1], [0], [0], [1], [0, 0, 1, 1], [], []>} : vector<4x16xf32>, vector<16x64xf32>, vector<4x64xf32> -> vector<4x64xf32>
    %77 = arith.addf %75, %76 : vector<4x64xf32>
    %78 = vector.extract_strided_slice %77 {offsets = [0, 0], sizes = [4, 16], strides = [1, 1]} : vector<4x64xf32> to vector<4x16xf32>
    %79 = arith.negf %78 : vector<4x16xf32>
    %80 = math.exp %79 : vector<4x16xf32>
    %cst_25 = arith.constant 1.000000e+00 : f32
    %81 = vector.broadcast %cst_25 : f32 to vector<4x16xf32>
    %82 = arith.addf %81, %80 : vector<4x16xf32>
    %83 = arith.divf %81, %82 : vector<4x16xf32>
    %84 = vector.extract_strided_slice %77 {offsets = [0, 16], sizes = [4, 16], strides = [1, 1]} : vector<4x64xf32> to vector<4x16xf32>
    %85 = arith.negf %84 : vector<4x16xf32>
    %86 = math.exp %85 : vector<4x16xf32>
    %cst_26 = arith.constant 1.000000e+00 : f32
    %87 = vector.broadcast %cst_26 : f32 to vector<4x16xf32>
    %88 = arith.addf %87, %86 : vector<4x16xf32>
    %89 = arith.divf %87, %88 : vector<4x16xf32>
    %90 = vector.extract_strided_slice %77 {offsets = [0, 32], sizes = [4, 16], strides = [1, 1]} : vector<4x64xf32> to vector<4x16xf32>
    %91 = math.tanh %90 : vector<4x16xf32>
    %92 = vector.extract_strided_slice %77 {offsets = [0, 48], sizes = [4, 16], strides = [1, 1]} : vector<4x64xf32> to vector<4x16xf32>
    %93 = arith.negf %92 : vector<4x16xf32>
    %94 = math.exp %93 : vector<4x16xf32>
    %cst_27 = arith.constant 1.000000e+00 : f32
    %95 = vector.broadcast %cst_27 : f32 to vector<4x16xf32>
    %96 = arith.addf %95, %94 : vector<4x16xf32>
    %97 = arith.divf %95, %96 : vector<4x16xf32>
    %98 = arith.mulf %89, %69 : vector<4x16xf32>
    %99 = arith.mulf %83, %91 : vector<4x16xf32>
    %100 = arith.addf %98, %99 : vector<4x16xf32>
    %101 = math.tanh %100 : vector<4x16xf32>
    %102 = arith.mulf %97, %101 : vector<4x16xf32>
    %c3_i32 = arith.constant 3 : i32
    %c4_i32_28 = arith.constant 4 : i32
    %103 = arith.muli %c3_i32, %c4_i32_28 : i32
    %104 = tpu.assume_multiple %103, 4 : i32
    %105 = arith.index_cast %104 : i32 to index
    %c0_29 = arith.constant 0 : index
    %106 = vector.load %arg18[%105, %c0_29] : memref<32x64xf32, #tpu.memory_space<vmem>>, vector<4x64xf32>
    %cst_30 = arith.constant dense<0.000000e+00> : vector<4x64xf32>
    %107 = tpu.matmul %102, %7, %cst_30 {dimension_numbers = #tpu.dot_dimension_numbers<[1], [0], [0], [1], [0, 0, 1, 1], [], []>} : vector<4x16xf32>, vector<16x64xf32>, vector<4x64xf32> -> vector<4x64xf32>
    %108 = arith.addf %106, %107 : vector<4x64xf32>
    %109 = vector.extract_strided_slice %108 {offsets = [0, 0], sizes = [4, 16], strides = [1, 1]} : vector<4x64xf32> to vector<4x16xf32>
    %110 = arith.negf %109 : vector<4x16xf32>
    %111 = math.exp %110 : vector<4x16xf32>
    %cst_31 = arith.constant 1.000000e+00 : f32
    %112 = vector.broadcast %cst_31 : f32 to vector<4x16xf32>
    %113 = arith.addf %112, %111 : vector<4x16xf32>
    %114 = arith.divf %112, %113 : vector<4x16xf32>
    %115 = vector.extract_strided_slice %108 {offsets = [0, 16], sizes = [4, 16], strides = [1, 1]} : vector<4x64xf32> to vector<4x16xf32>
    %116 = arith.negf %115 : vector<4x16xf32>
    %117 = math.exp %116 : vector<4x16xf32>
    %cst_32 = arith.constant 1.000000e+00 : f32
    %118 = vector.broadcast %cst_32 : f32 to vector<4x16xf32>
    %119 = arith.addf %118, %117 : vector<4x16xf32>
    %120 = arith.divf %118, %119 : vector<4x16xf32>
    %121 = vector.extract_strided_slice %108 {offsets = [0, 32], sizes = [4, 16], strides = [1, 1]} : vector<4x64xf32> to vector<4x16xf32>
    %122 = math.tanh %121 : vector<4x16xf32>
    %123 = vector.extract_strided_slice %108 {offsets = [0, 48], sizes = [4, 16], strides = [1, 1]} : vector<4x64xf32> to vector<4x16xf32>
    %124 = arith.negf %123 : vector<4x16xf32>
    %125 = math.exp %124 : vector<4x16xf32>
    %cst_33 = arith.constant 1.000000e+00 : f32
    %126 = vector.broadcast %cst_33 : f32 to vector<4x16xf32>
    %127 = arith.addf %126, %125 : vector<4x16xf32>
    %128 = arith.divf %126, %127 : vector<4x16xf32>
    %129 = arith.mulf %120, %100 : vector<4x16xf32>
    %130 = arith.mulf %114, %122 : vector<4x16xf32>
    %131 = arith.addf %129, %130 : vector<4x16xf32>
    %132 = math.tanh %131 : vector<4x16xf32>
    %133 = arith.mulf %128, %132 : vector<4x16xf32>
    %c4_i32_34 = arith.constant 4 : i32
    %c4_i32_35 = arith.constant 4 : i32
    %134 = arith.muli %c4_i32_34, %c4_i32_35 : i32
    %135 = tpu.assume_multiple %134, 4 : i32
    %136 = arith.index_cast %135 : i32 to index
    %c0_36 = arith.constant 0 : index
    %137 = vector.load %arg18[%136, %c0_36] : memref<32x64xf32, #tpu.memory_space<vmem>>, vector<4x64xf32>
    %cst_37 = arith.constant dense<0.000000e+00> : vector<4x64xf32>
    %138 = tpu.matmul %133, %7, %cst_37 {dimension_numbers = #tpu.dot_dimension_numbers<[1], [0], [0], [1], [0, 0, 1, 1], [], []>} : vector<4x16xf32>, vector<16x64xf32>, vector<4x64xf32> -> vector<4x64xf32>
    %139 = arith.addf %137, %138 : vector<4x64xf32>
    %140 = vector.extract_strided_slice %139 {offsets = [0, 0], sizes = [4, 16], strides = [1, 1]} : vector<4x64xf32> to vector<4x16xf32>
    %141 = arith.negf %140 : vector<4x16xf32>
    %142 = math.exp %141 : vector<4x16xf32>
    %cst_38 = arith.constant 1.000000e+00 : f32
    %143 = vector.broadcast %cst_38 : f32 to vector<4x16xf32>
    %144 = arith.addf %143, %142 : vector<4x16xf32>
    %145 = arith.divf %143, %144 : vector<4x16xf32>
    %146 = vector.extract_strided_slice %139 {offsets = [0, 16], sizes = [4, 16], strides = [1, 1]} : vector<4x64xf32> to vector<4x16xf32>
    %147 = arith.negf %146 : vector<4x16xf32>
    %148 = math.exp %147 : vector<4x16xf32>
    %cst_39 = arith.constant 1.000000e+00 : f32
    %149 = vector.broadcast %cst_39 : f32 to vector<4x16xf32>
    %150 = arith.addf %149, %148 : vector<4x16xf32>
    %151 = arith.divf %149, %150 : vector<4x16xf32>
    %152 = vector.extract_strided_slice %139 {offsets = [0, 32], sizes = [4, 16], strides = [1, 1]} : vector<4x64xf32> to vector<4x16xf32>
    %153 = math.tanh %152 : vector<4x16xf32>
    %154 = vector.extract_strided_slice %139 {offsets = [0, 48], sizes = [4, 16], strides = [1, 1]} : vector<4x64xf32> to vector<4x16xf32>
    %155 = arith.negf %154 : vector<4x16xf32>
    %156 = math.exp %155 : vector<4x16xf32>
    %cst_40 = arith.constant 1.000000e+00 : f32
    %157 = vector.broadcast %cst_40 : f32 to vector<4x16xf32>
    %158 = arith.addf %157, %156 : vector<4x16xf32>
    %159 = arith.divf %157, %158 : vector<4x16xf32>
    %160 = arith.mulf %151, %131 : vector<4x16xf32>
    %161 = arith.mulf %145, %153 : vector<4x16xf32>
    %162 = arith.addf %160, %161 : vector<4x16xf32>
    %163 = math.tanh %162 : vector<4x16xf32>
    %164 = arith.mulf %159, %163 : vector<4x16xf32>
    %c5_i32 = arith.constant 5 : i32
    %c4_i32_41 = arith.constant 4 : i32
    %165 = arith.muli %c5_i32, %c4_i32_41 : i32
    %166 = tpu.assume_multiple %165, 4 : i32
    %167 = arith.index_cast %166 : i32 to index
    %c0_42 = arith.constant 0 : index
    %168 = vector.load %arg18[%167, %c0_42] : memref<32x64xf32, #tpu.memory_space<vmem>>, vector<4x64xf32>
    %cst_43 = arith.constant dense<0.000000e+00> : vector<4x64xf32>
    %169 = tpu.matmul %164, %7, %cst_43 {dimension_numbers = #tpu.dot_dimension_numbers<[1], [0], [0], [1], [0, 0, 1, 1], [], []>} : vector<4x16xf32>, vector<16x64xf32>, vector<4x64xf32> -> vector<4x64xf32>
    %170 = arith.addf %168, %169 : vector<4x64xf32>
    %171 = vector.extract_strided_slice %170 {offsets = [0, 0], sizes = [4, 16], strides = [1, 1]} : vector<4x64xf32> to vector<4x16xf32>
    %172 = arith.negf %171 : vector<4x16xf32>
    %173 = math.exp %172 : vector<4x16xf32>
    %cst_44 = arith.constant 1.000000e+00 : f32
    %174 = vector.broadcast %cst_44 : f32 to vector<4x16xf32>
    %175 = arith.addf %174, %173 : vector<4x16xf32>
    %176 = arith.divf %174, %175 : vector<4x16xf32>
    %177 = vector.extract_strided_slice %170 {offsets = [0, 16], sizes = [4, 16], strides = [1, 1]} : vector<4x64xf32> to vector<4x16xf32>
    %178 = arith.negf %177 : vector<4x16xf32>
    %179 = math.exp %178 : vector<4x16xf32>
    %cst_45 = arith.constant 1.000000e+00 : f32
    %180 = vector.broadcast %cst_45 : f32 to vector<4x16xf32>
    %181 = arith.addf %180, %179 : vector<4x16xf32>
    %182 = arith.divf %180, %181 : vector<4x16xf32>
    %183 = vector.extract_strided_slice %170 {offsets = [0, 32], sizes = [4, 16], strides = [1, 1]} : vector<4x64xf32> to vector<4x16xf32>
    %184 = math.tanh %183 : vector<4x16xf32>
    %185 = vector.extract_strided_slice %170 {offsets = [0, 48], sizes = [4, 16], strides = [1, 1]} : vector<4x64xf32> to vector<4x16xf32>
    %186 = arith.negf %185 : vector<4x16xf32>
    %187 = math.exp %186 : vector<4x16xf32>
    %cst_46 = arith.constant 1.000000e+00 : f32
    %188 = vector.broadcast %cst_46 : f32 to vector<4x16xf32>
    %189 = arith.addf %188, %187 : vector<4x16xf32>
    %190 = arith.divf %188, %189 : vector<4x16xf32>
    %191 = arith.mulf %182, %162 : vector<4x16xf32>
    %192 = arith.mulf %176, %184 : vector<4x16xf32>
    %193 = arith.addf %191, %192 : vector<4x16xf32>
    %194 = math.tanh %193 : vector<4x16xf32>
    %195 = arith.mulf %190, %194 : vector<4x16xf32>
    %c6_i32 = arith.constant 6 : i32
    %c4_i32_47 = arith.constant 4 : i32
    %196 = arith.muli %c6_i32, %c4_i32_47 : i32
    %197 = tpu.assume_multiple %196, 4 : i32
    %198 = arith.index_cast %197 : i32 to index
    %c0_48 = arith.constant 0 : index
    %199 = vector.load %arg18[%198, %c0_48] : memref<32x64xf32, #tpu.memory_space<vmem>>, vector<4x64xf32>
    %cst_49 = arith.constant dense<0.000000e+00> : vector<4x64xf32>
    %200 = tpu.matmul %195, %7, %cst_49 {dimension_numbers = #tpu.dot_dimension_numbers<[1], [0], [0], [1], [0, 0, 1, 1], [], []>} : vector<4x16xf32>, vector<16x64xf32>, vector<4x64xf32> -> vector<4x64xf32>
    %201 = arith.addf %199, %200 : vector<4x64xf32>
    %202 = vector.extract_strided_slice %201 {offsets = [0, 0], sizes = [4, 16], strides = [1, 1]} : vector<4x64xf32> to vector<4x16xf32>
    %203 = arith.negf %202 : vector<4x16xf32>
    %204 = math.exp %203 : vector<4x16xf32>
    %cst_50 = arith.constant 1.000000e+00 : f32
    %205 = vector.broadcast %cst_50 : f32 to vector<4x16xf32>
    %206 = arith.addf %205, %204 : vector<4x16xf32>
    %207 = arith.divf %205, %206 : vector<4x16xf32>
    %208 = vector.extract_strided_slice %201 {offsets = [0, 16], sizes = [4, 16], strides = [1, 1]} : vector<4x64xf32> to vector<4x16xf32>
    %209 = arith.negf %208 : vector<4x16xf32>
    %210 = math.exp %209 : vector<4x16xf32>
    %cst_51 = arith.constant 1.000000e+00 : f32
    %211 = vector.broadcast %cst_51 : f32 to vector<4x16xf32>
    %212 = arith.addf %211, %210 : vector<4x16xf32>
    %213 = arith.divf %211, %212 : vector<4x16xf32>
    %214 = vector.extract_strided_slice %201 {offsets = [0, 32], sizes = [4, 16], strides = [1, 1]} : vector<4x64xf32> to vector<4x16xf32>
    %215 = math.tanh %214 : vector<4x16xf32>
    %216 = vector.extract_strided_slice %201 {offsets = [0, 48], sizes = [4, 16], strides = [1, 1]} : vector<4x64xf32> to vector<4x16xf32>
    %217 = arith.negf %216 : vector<4x16xf32>
    %218 = math.exp %217 : vector<4x16xf32>
    %cst_52 = arith.constant 1.000000e+00 : f32
    %219 = vector.broadcast %cst_52 : f32 to vector<4x16xf32>
    %220 = arith.addf %219, %218 : vector<4x16xf32>
    %221 = arith.divf %219, %220 : vector<4x16xf32>
    %222 = arith.mulf %213, %193 : vector<4x16xf32>
    %223 = arith.mulf %207, %215 : vector<4x16xf32>
    %224 = arith.addf %222, %223 : vector<4x16xf32>
    %225 = math.tanh %224 : vector<4x16xf32>
    %226 = arith.mulf %221, %225 : vector<4x16xf32>
    %c7_i32 = arith.constant 7 : i32
    %c4_i32_53 = arith.constant 4 : i32
    %227 = arith.muli %c7_i32, %c4_i32_53 : i32
    %228 = tpu.assume_multiple %227, 4 : i32
    %229 = arith.index_cast %228 : i32 to index
    %c0_54 = arith.constant 0 : index
    %230 = vector.load %arg18[%229, %c0_54] : memref<32x64xf32, #tpu.memory_space<vmem>>, vector<4x64xf32>
    %cst_55 = arith.constant dense<0.000000e+00> : vector<4x64xf32>
    %231 = tpu.matmul %226, %7, %cst_55 {dimension_numbers = #tpu.dot_dimension_numbers<[1], [0], [0], [1], [0, 0, 1, 1], [], []>} : vector<4x16xf32>, vector<16x64xf32>, vector<4x64xf32> -> vector<4x64xf32>
    %232 = arith.addf %230, %231 : vector<4x64xf32>
    %233 = vector.extract_strided_slice %232 {offsets = [0, 0], sizes = [4, 16], strides = [1, 1]} : vector<4x64xf32> to vector<4x16xf32>
    %234 = arith.negf %233 : vector<4x16xf32>
    %235 = math.exp %234 : vector<4x16xf32>
    %cst_56 = arith.constant 1.000000e+00 : f32
    %236 = vector.broadcast %cst_56 : f32 to vector<4x16xf32>
    %237 = arith.addf %236, %235 : vector<4x16xf32>
    %238 = arith.divf %236, %237 : vector<4x16xf32>
    %239 = vector.extract_strided_slice %232 {offsets = [0, 16], sizes = [4, 16], strides = [1, 1]} : vector<4x64xf32> to vector<4x16xf32>
    %240 = arith.negf %239 : vector<4x16xf32>
    %241 = math.exp %240 : vector<4x16xf32>
    %cst_57 = arith.constant 1.000000e+00 : f32
    %242 = vector.broadcast %cst_57 : f32 to vector<4x16xf32>
    %243 = arith.addf %242, %241 : vector<4x16xf32>
    %244 = arith.divf %242, %243 : vector<4x16xf32>
    %245 = vector.extract_strided_slice %232 {offsets = [0, 32], sizes = [4, 16], strides = [1, 1]} : vector<4x64xf32> to vector<4x16xf32>
    %246 = math.tanh %245 : vector<4x16xf32>
    %247 = vector.extract_strided_slice %232 {offsets = [0, 48], sizes = [4, 16], strides = [1, 1]} : vector<4x64xf32> to vector<4x16xf32>
    %248 = arith.negf %247 : vector<4x16xf32>
    %249 = math.exp %248 : vector<4x16xf32>
    %cst_58 = arith.constant 1.000000e+00 : f32
    %250 = vector.broadcast %cst_58 : f32 to vector<4x16xf32>
    %251 = arith.addf %250, %249 : vector<4x16xf32>
    %252 = arith.divf %250, %251 : vector<4x16xf32>
    %253 = arith.mulf %244, %224 : vector<4x16xf32>
    %254 = arith.mulf %238, %246 : vector<4x16xf32>
    %255 = arith.addf %253, %254 : vector<4x16xf32>
    %256 = math.tanh %255 : vector<4x16xf32>
    %257 = arith.mulf %252, %256 : vector<4x16xf32>
    %c8_i32 = arith.constant 8 : i32
    %258 = vector.extract_strided_slice %0 {offsets = [28, 0], sizes = [4, 2], strides = [1, 1]} : vector<32x2xf32> to vector<4x2xf32>
    %c0_59 = arith.constant 0 : index
    %c0_60 = arith.constant 0 : index
    %259 = vector.load %arg4[%c0_59, %c0_60] : memref<2x16xf32, #tpu.memory_space<vmem>>, vector<2x16xf32>
    %cst_61 = arith.constant dense<0.000000e+00> : vector<4x16xf32>
    %260 = tpu.matmul %258, %259, %cst_61 {dimension_numbers = #tpu.dot_dimension_numbers<[1], [0], [0], [1], [0, 0, 1, 1], [], []>} : vector<4x2xf32>, vector<2x16xf32>, vector<4x16xf32> -> vector<4x16xf32>
    %c0_62 = arith.constant 0 : index
    %c0_63 = arith.constant 0 : index
    %261 = vector.load %arg5[%c0_62, %c0_63] : memref<1x16xf32, #tpu.memory_space<vmem>>, vector<1x16xf32>
    %262 = vector.broadcast %261 : vector<1x16xf32> to vector<4x16xf32>
    %263 = arith.addf %260, %262 : vector<4x16xf32>
    %c0_64 = arith.constant 0 : index
    %c0_65 = arith.constant 0 : index
    %264 = vector.load %arg6[%c0_64, %c0_65] : memref<16x512xf32, #tpu.memory_space<vmem>>, vector<16x512xf32>
    %cst_66 = arith.constant dense<0.000000e+00> : vector<4x512xf32>
    %265 = tpu.matmul %263, %264, %cst_66 {dimension_numbers = #tpu.dot_dimension_numbers<[1], [0], [0], [1], [0, 0, 1, 1], [], []>} : vector<4x16xf32>, vector<16x512xf32>, vector<4x512xf32> -> vector<4x512xf32>
    %c0_67 = arith.constant 0 : index
    %c0_68 = arith.constant 0 : index
    %266 = vector.load %arg7[%c0_67, %c0_68] : memref<16x512xf32, #tpu.memory_space<vmem>>, vector<16x512xf32>
    %cst_69 = arith.constant dense<0.000000e+00> : vector<4x512xf32>
    %267 = tpu.matmul %257, %266, %cst_69 {dimension_numbers = #tpu.dot_dimension_numbers<[1], [0], [0], [1], [0, 0, 1, 1], [], []>} : vector<4x16xf32>, vector<16x512xf32>, vector<4x512xf32> -> vector<4x512xf32>
    %268 = arith.addf %265, %267 : vector<4x512xf32>
    %c0_70 = arith.constant 0 : index
    %c0_71 = arith.constant 0 : index
    %269 = vector.load %arg8[%c0_70, %c0_71] : memref<1x512xf32, #tpu.memory_space<vmem>>, vector<1x512xf32>
    %270 = vector.broadcast %269 : vector<1x512xf32> to vector<4x512xf32>
    %271 = arith.addf %268, %270 : vector<4x512xf32>
    %c0_72 = arith.constant 0 : index
    %c0_73 = arith.constant 0 : index
    %272 = vector.load %arg6[%c0_72, %c0_73] : memref<16x512xf32, #tpu.memory_space<vmem>>, vector<16x512xf32>
    %cst_74 = arith.constant dense<0.000000e+00> : vector<4x512xf32>
    %273 = tpu.matmul %260, %272, %cst_74 {dimension_numbers = #tpu.dot_dimension_numbers<[1], [0], [0], [1], [0, 0, 1, 1], [], []>} : vector<4x16xf32>, vector<16x512xf32>, vector<4x512xf32> -> vector<4x512xf32>
    %c0_75 = arith.constant 0 : index
    %c0_76 = arith.constant 0 : index
    %274 = vector.load %arg9[%c0_75, %c0_76] : memref<512x32xf32, #tpu.memory_space<vmem>>, vector<512x32xf32>
    %c0_77 = arith.constant 0 : index
    %c0_78 = arith.constant 0 : index
    %275 = vector.load %arg10[%c0_77, %c0_78] : memref<1x32xf32, #tpu.memory_space<vmem>>, vector<1x32xf32>
    %276 = vector.extract_strided_slice %271 {offsets = [0, 0], sizes = [2, 512], strides = [1, 1]} : vector<4x512xf32> to vector<2x512xf32>
    %277 = vector.shape_cast %276 : vector<2x512xf32> to vector<1x2x512xf32>
    %278 = vector.extract_strided_slice %273 {offsets = [0, 0], sizes = [2, 512], strides = [1, 1]} : vector<4x512xf32> to vector<2x512xf32>
    %279 = vector.shape_cast %278 : vector<2x512xf32> to vector<2x1x512xf32>
    %280 = vector.broadcast %277 : vector<1x2x512xf32> to vector<2x2x512xf32>
    %281 = vector.broadcast %279 : vector<2x1x512xf32> to vector<2x2x512xf32>
    %282 = arith.subf %280, %281 : vector<2x2x512xf32>
    %cst_79 = arith.constant 0.000000e+00 : f32
    %283 = vector.broadcast %cst_79 : f32 to vector<2x2x512xf32>
    %284 = arith.maximumf %282, %283 : vector<2x2x512xf32>
    %285 = vector.shape_cast %284 : vector<2x2x512xf32> to vector<4x512xf32>
    %cst_80 = arith.constant dense<0.000000e+00> : vector<4x32xf32>
    %286 = tpu.matmul %285, %274, %cst_80 {dimension_numbers = #tpu.dot_dimension_numbers<[1], [0], [0], [1], [0, 0, 1, 1], [], []>} : vector<4x512xf32>, vector<512x32xf32>, vector<4x32xf32> -> vector<4x32xf32>
    %287 = vector.broadcast %275 : vector<1x32xf32> to vector<4x32xf32>
    %288 = arith.addf %286, %287 : vector<4x32xf32>
    %cst_81 = arith.constant 0.000000e+00 : f32
    %289 = vector.broadcast %cst_81 : f32 to vector<4x32xf32>
    %290 = arith.maximumf %288, %289 : vector<4x32xf32>
    %291 = vector.shape_cast %290 : vector<4x32xf32> to vector<2x2x32xf32>
    %cst_82 = arith.constant dense<0xFF800000> : vector<2x32xf32>
    %292 = vector.multi_reduction <maximumf>, %291, %cst_82 [1] : vector<2x2x32xf32> to vector<2x32xf32>
    %c0_83 = arith.constant 0 : index
    %c0_84 = arith.constant 0 : index
    %293 = vector.load %arg19[%c0_83, %c0_84] : memref<4x32xf32, #tpu.memory_space<vmem>>, vector<2x32xf32>
    tpu.vector_store %arg19[%c0_83, %c0_84], %292 {strides = array<i32>} : memref<4x32xf32, #tpu.memory_space<vmem>>, vector<2x32xf32>,
    %294 = vector.extract_strided_slice %271 {offsets = [2, 0], sizes = [2, 512], strides = [1, 1]} : vector<4x512xf32> to vector<2x512xf32>
    %295 = vector.shape_cast %294 : vector<2x512xf32> to vector<1x2x512xf32>
    %296 = vector.extract_strided_slice %273 {offsets = [2, 0], sizes = [2, 512], strides = [1, 1]} : vector<4x512xf32> to vector<2x512xf32>
    %297 = vector.shape_cast %296 : vector<2x512xf32> to vector<2x1x512xf32>
    %298 = vector.broadcast %295 : vector<1x2x512xf32> to vector<2x2x512xf32>
    %299 = vector.broadcast %297 : vector<2x1x512xf32> to vector<2x2x512xf32>
    %300 = arith.subf %298, %299 : vector<2x2x512xf32>
    %cst_85 = arith.constant 0.000000e+00 : f32
    %301 = vector.broadcast %cst_85 : f32 to vector<2x2x512xf32>
    %302 = arith.maximumf %300, %301 : vector<2x2x512xf32>
    %303 = vector.shape_cast %302 : vector<2x2x512xf32> to vector<4x512xf32>
    %cst_86 = arith.constant dense<0.000000e+00> : vector<4x32xf32>
    %304 = tpu.matmul %303, %274, %cst_86 {dimension_numbers = #tpu.dot_dimension_numbers<[1], [0], [0], [1], [0, 0, 1, 1], [], []>} : vector<4x512xf32>, vector<512x32xf32>, vector<4x32xf32> -> vector<4x32xf32>
    %305 = vector.broadcast %275 : vector<1x32xf32> to vector<4x32xf32>
    %306 = arith.addf %304, %305 : vector<4x32xf32>
    %cst_87 = arith.constant 0.000000e+00 : f32
    %307 = vector.broadcast %cst_87 : f32 to vector<4x32xf32>
    %308 = arith.maximumf %306, %307 : vector<4x32xf32>
    %309 = vector.shape_cast %308 : vector<4x32xf32> to vector<2x2x32xf32>
    %cst_88 = arith.constant dense<0xFF800000> : vector<2x32xf32>
    %310 = vector.multi_reduction <maximumf>, %309, %cst_88 [1] : vector<2x2x32xf32> to vector<2x32xf32>
    %c2 = arith.constant 2 : index
    %c0_89 = arith.constant 0 : index
    %311 = vector.load %arg19[%c2, %c0_89] : memref<4x32xf32, #tpu.memory_space<vmem>>, vector<2x32xf32>
    tpu.vector_store %arg19[%c2, %c0_89], %310 {strides = array<i32>} : memref<4x32xf32, #tpu.memory_space<vmem>>, vector<2x32xf32>,
    %c0_90 = arith.constant 0 : index
    %c0_91 = arith.constant 0 : index
    %312 = vector.load %arg19[%c0_90, %c0_91] : memref<4x32xf32, #tpu.memory_space<vmem>>, vector<4x32xf32>
    %c0_92 = arith.constant 0 : index
    %c0_93 = arith.constant 0 : index
    %313 = vector.load %arg11[%c0_92, %c0_93] : memref<16x32xf32, #tpu.memory_space<vmem>>, vector<16x32xf32>
    %cst_94 = arith.constant dense<0.000000e+00> : vector<4x32xf32>
    %314 = tpu.matmul %257, %313, %cst_94 {dimension_numbers = #tpu.dot_dimension_numbers<[1], [0], [0], [1], [0, 0, 1, 1], [], []>} : vector<4x16xf32>, vector<16x32xf32>, vector<4x32xf32> -> vector<4x32xf32>
    %c0_95 = arith.constant 0 : index
    %c0_96 = arith.constant 0 : index
    %315 = vector.load %arg12[%c0_95, %c0_96] : memref<32x32xf32, #tpu.memory_space<vmem>>, vector<32x32xf32>
    %cst_97 = arith.constant dense<0.000000e+00> : vector<4x32xf32>
    %316 = tpu.matmul %312, %315, %cst_97 {dimension_numbers = #tpu.dot_dimension_numbers<[1], [0], [0], [1], [0, 0, 1, 1], [], []>} : vector<4x32xf32>, vector<32x32xf32>, vector<4x32xf32> -> vector<4x32xf32>
    %317 = arith.addf %314, %316 : vector<4x32xf32>
    %c0_98 = arith.constant 0 : index
    %c0_99 = arith.constant 0 : index
    %318 = vector.load %arg13[%c0_98, %c0_99] : memref<1x32xf32, #tpu.memory_space<vmem>>, vector<1x32xf32>
    %319 = vector.broadcast %318 : vector<1x32xf32> to vector<4x32xf32>
    %320 = arith.addf %317, %319 : vector<4x32xf32>
    %cst_100 = arith.constant 0.000000e+00 : f32
    %321 = vector.broadcast %cst_100 : f32 to vector<4x32xf32>
    %322 = arith.maximumf %320, %321 : vector<4x32xf32>
    %c0_101 = arith.constant 0 : index
    %c0_102 = arith.constant 0 : index
    %323 = vector.load %arg14[%c0_101, %c0_102] : memref<32x16xf32, #tpu.memory_space<vmem>>, vector<32x16xf32>
    %cst_103 = arith.constant dense<0.000000e+00> : vector<4x16xf32>
    %324 = tpu.matmul %322, %323, %cst_103 {dimension_numbers = #tpu.dot_dimension_numbers<[1], [0], [0], [1], [0, 0, 1, 1], [], []>} : vector<4x32xf32>, vector<32x16xf32>, vector<4x16xf32> -> vector<4x16xf32>
    %c0_104 = arith.constant 0 : index
    %c0_105 = arith.constant 0 : index
    %325 = vector.load %arg15[%c0_104, %c0_105] : memref<1x16xf32, #tpu.memory_space<vmem>>, vector<1x16xf32>
    %326 = vector.broadcast %325 : vector<1x16xf32> to vector<4x16xf32>
    %327 = arith.addf %324, %326 : vector<4x16xf32>
    %cst_106 = arith.constant 0.000000e+00 : f32
    %328 = vector.broadcast %cst_106 : f32 to vector<4x16xf32>
    %329 = arith.maximumf %327, %328 : vector<4x16xf32>
    %c0_107 = arith.constant 0 : index
    %c0_108 = arith.constant 0 : index
    %330 = vector.load %arg16[%c0_107, %c0_108] : memref<4x48xf32, #tpu.memory_space<vmem>>, vector<4x16xf32>
    tpu.vector_store %arg16[%c0_107, %c0_108], %257 {strides = array<i32>} : memref<4x48xf32, #tpu.memory_space<vmem>>, vector<4x16xf32>,
    %c0_109 = arith.constant 0 : index
    %c16 = arith.constant 16 : index
    %331 = vector.load %arg16[%c0_109, %c16] : memref<4x48xf32, #tpu.memory_space<vmem>>, vector<4x32xf32>
    tpu.vector_store %arg16[%c0_109, %c16], %312 {strides = array<i32>} : memref<4x48xf32, #tpu.memory_space<vmem>>, vector<4x32xf32>,
    %332 = tpu.iota {dimensions = array<i32: 1>} : vector<4x16xi32>
    %c8_i32_110 = arith.constant 8 : i32
    %333 = vector.broadcast %c8_i32_110 : i32 to vector<4x16xi32>
    %334 = arith.cmpi slt, %332, %333 : vector<4x16xi32>
    %cst_111 = arith.constant 5.000000e-01 : f32
    %335 = vector.broadcast %cst_111 : f32 to vector<4x16xf32>
    %336 = arith.mulf %335, %329 : vector<4x16xf32>
    %337 = math.exp %336 : vector<4x16xf32>
    %338 = arith.select %334, %329, %337 : vector<4x16xi1>, vector<4x16xf32>
    %c0_112 = arith.constant 0 : index
    %c0_113 = arith.constant 0 : index
    %339 = vector.load %arg17[%c0_112, %c0_113] : memref<4x16xf32, #tpu.memory_space<vmem>>, vector<4x16xf32>
    tpu.vector_store %arg17[%c0_112, %c0_113], %338 {strides = array<i32>} : memref<4x16xf32, #tpu.memory_space<vmem>>, vector<4x16xf32>,
    return
  }
}

</mosaic_0001>

<bundles_post_ra>
// kernel: tpu_custom_call.1
= control target key start
LH: loop header
LB: loop body
LE: loop exit
PB: predicated region body
PF: predicated region fallthrough
CT: control target
= control target key end

     0   :  { %s3927_s0 = inlined_call_operand.vmem [shape: f32[32,2], index: 0, kind: input, shape index: {}]   ;;  %s3928_s1 = inlined_call_operand.vmem [shape: f32[2,64], index: 1, kind: input, shape index: {}]   ;;  %s3929_s2 = inlined_call_operand.vmem [shape: f32[16,64], index: 2, kind: input, shape index: {}]   ;;  %s3930_s3 = inlined_call_operand.vmem [shape: f32[1,64], index: 3, kind: input, shape index: {}]   ;;  %s3931_s4 = inlined_call_operand.vmem [shape: f32[2,16], index: 4, kind: input, shape index: {}]   ;;  %s3932_s5 = inlined_call_operand.vmem [shape: f32[1,16], index: 5, kind: input, shape index: {}]   ;;  %s3933_s6 = inlined_call_operand.vmem [shape: f32[16,512], index: 6, kind: input, shape index: {}]   ;;  %s3934_s7 = inlined_call_operand.vmem [shape: f32[16,512], index: 7, kind: input, shape index: {}]   ;;  %s3935_s8 = inlined_call_operand.vmem [shape: f32[1,512], index: 8, kind: input, shape index: {}]   ;;  %s3936_s9 = inlined_call_operand.vmem [shape: f32[512,32], index: 9, kind: input, shape index: {}]   ;;  %s3937_s10 = inlined_call_operand.vmem [shape: f32[1,32], index: 10, kind: input, shape index: {}]   ;;  %s3938_s11 = inlined_call_operand.vmem [shape: f32[16,32], index: 11, kind: input, shape index: {}]   ;;  %s3939_s12 = inlined_call_operand.vmem [shape: f32[32,32], index: 12, kind: input, shape index: {}]   ;;  %s3940_s13 = inlined_call_operand.vmem [shape: f32[1,32], index: 13, kind: input, shape index: {}]   ;;  %s3941_s14 = inlined_call_operand.vmem [shape: f32[32,16], index: 14, kind: input, shape index: {}]   ;;  %s3942_s15 = inlined_call_operand.vmem [shape: f32[1,16], index: 15, kind: input, shape index: {}]   ;;  %s3943_s16 = inlined_call_operand.hbm [shape: f32[4,48], index: 16, kind: output, shape index: {0}]   ;;  %s3944_s17 = inlined_call_operand.hbm [shape: f32[4,16], index: 17, kind: output, shape index: {1}]  }
   0x1   :  { %3956 = sst [smem:[#allocation15_spill]] %s3927_s0 }
   0x2   :  { %3957 = sst [smem:[#allocation16_spill]] %s3928_s1 }
   0x3   :  { %23 = vsyncpa [#allocation5], 0  ;;  %s3958_s26 = sld [smem:[#allocation16_spill]]  ;;  %vm82_vm0 = vcmask 1041408   ;;  %s3959_s29 = sld [smem:[#allocation15_spill]]  ;;  %vm69_vm1 = vcmask 15360  }
   0x4   :  { %v176_v4 = vld [vmem:[%s3929_s2] sm:$0xff]  ;;  %v177_v6 = vld [vmem:[%s3929_s2 + $0x8] sm:$0xff] }
   0x9   :  { %v61_v0 = vld [vmem:[%s3958_s26] sm:$0x3]  ;;  %v58_v2 = vld [vmem:[%s3959_s29 + $0x8] sm:$0xff]  ;;  %v59_v3 = vld [vmem:[%s3959_s29 + $0x10] sm:$0xff] }
   0xa   :  { %v57_v1 = vld [vmem:[%s3959_s29] sm:$0xff]  ;;  %2762 = vmatprep.subr.msk.mxu0 %vm82_vm0, %v61_v0  ;;  %3051 = vmatprep.subr.msk.mxu1 %vm82_vm0, %v61_v0  ;;  %v3305_v5 = vld [vmem:[%s3959_s29 + $0x18] sm:$0xff] }
   0xb   :  { %2764 = vmatprep.mubr.msk.f32.mxu0 %vm69_vm1, %v57_v1  ;;  %2763 = vmatpush3.msk.msra.mxu0 %vm82_vm0, %v61_v0 }
   0xc   :  { %24 = vsyncpa [#allocation7], 0  ;;  %2765 = vmatmul.mubr.msk.f32.vlgmr.msra.gmra.mrb[0].mxu0 %vm69_vm1, %v58_v2  ;;  %3052 = vmatpush3.msk.msra.mxu1 %vm82_vm0, %v61_v0  ;;  %v3312_v7 = vpack.c.bf16 %v177_v6, %v176_v4  ;;  %v3949_v8 = vmov 0.0|0.0   ;;  %vm3183_vm2 = vmmov 0   ;;  %v3947_v9 = vmov 0.0   ;;  %s3186_s26 = smov 16  }
   0xd   :  { %2767 = vmatprep.mubr.msk.f32.mxu1 %vm69_vm1, %v59_v3  ;;  %2860 = vmatprep.subr.bf16.mxu1 %v3949_v8  ;;  %v2538_v10 = vld [vmem:[%s3930_s3] ss:$0 sm:$0xff]  ;;  %vm171_vm3 = vcmask 523264   ;;  %s3185_s3 = smov 96   ;;  %s3187_s27 = smov 32   ;;  %vm179_vm4 = vcmask 130048  }
   0xe   :  { %2768 = vmatmul.mubr.msk.f32.vlgmr.msra.gmra.mrb[0].mxu1 %vm69_vm1, %v3305_v5  ;;  %2866 = vmatprep.subr.bf16.mxu0 %v3949_v8  ;;  %s3188_s28 = smov 80   ;;  %vm2495_vm5 = vcmask 125952   ;;  %vm1935_vm6 = vcmask 254976   ;;  %vm1952_vm7 = vcmask 1041409   ;;  %vm2256_vm8 = vcmask 261120  }
   0xf   :  { %2862 = vmatpush3.bf16.msra.mxu1 %v3312_v7  ;;  %2774 = vmatprep.mubr.msk.f32.mxu1 %vm3183_vm2, %v3947_v9  ;;  %vm2500_vm9 = vcmask 388224  }
  0x10   :  { %2863 = vmatprep.subr.bf16.mxu1 %v3949_v8  ;;  %2868 = vmatpush3.bf16.msra.mxu0 %v3312_v7 }
  0x11   :  { %2788 = vmatprep.mubr.msk.f32.mxu0 %vm3183_vm2, %v3947_v9  ;;  %2872 = vmatprep.subr.bf16.mxu0 %v3949_v8 }
  0x12   :  { %2775 = vmatmul.mubr.f32.vlgmr.msra.gmra.mrb[2].mxu1 %v3947_v9 }
  0x13   :  { %2865 = vmatpush3.bf16.msra.mxu1 %v3312_v7  ;;  %2781 = vmatprep.mubr.msk.f32.mxu1 %vm3183_vm2, %v3947_v9 }
  0x14   :  { %2869 = vmatprep.subr.bf16.mxu1 %v3949_v8 }
  0xdf   :  { %v2766_v11 = vpop.f32.mrb[0].mxu0 }
  0xe0   :  { %v158_v12 = vadd.f32 %v2766_v11, %v2538_v10  ;;  %v152_v13 = vpop.f32.mrb[1].mxu0 }
  0xe1   :  { %v153_v14 = vadd.f32 %v2538_v10, %v152_v13  ;;  %v2769_v15 = vpop.f32.mrb[0].mxu1 }
  0xe2   :  { %173 = vst.msk [vmem:[#allocation2 + $0x8] sm:$0xff] %vm171_vm3, %v158_v12  ;;  %v168_v16 = vadd.f32 %v2769_v15, %v2538_v10  ;;  %v162_v17 = vpop.f32.mrb[1].mxu1 }
  0xe3   :  { %172 = vst.msk [vmem:[#allocation2] sm:$0xff] %vm171_vm3, %v153_v14  ;;  %v163_v18 = vadd.f32 %v2538_v10, %v162_v17 }
  0xe4   :  { %175 = vst.msk [vmem:[#allocation2 + $0x18] sm:$0xff] %vm171_vm3, %v168_v16 }
  0xe5   :  { %174 = vst.msk [vmem:[#allocation2 + $0x10] sm:$0xff] %vm171_vm3, %v163_v18  ;;  %v249_v19 = vpop.f32.mrb[2].mxu1 }
  0xe6   :  { %v2776_v20 = vpop.f32.mrb[3].mxu1 }
  0xe9   :  { %v381_v55 = vld [vmem:[#allocation2 + $0x8] sm:$0xf]  ;;  %v483_v13 = vld [vmem:[#allocation2 + $0xc] sm:$0xf] }
  0xea   :  { %v178_v21 = vld [vmem:[#allocation2] sm:$0xf]  ;;  %v279_v37 = vld [vmem:[#allocation2 + $0x4] sm:$0xf] }
  0xeb   :  { %v253_v22 = vadd.f32 %v249_v19, %v178_v21 }
  0xed   :  { %3068 = vtanh.f32 %v253_v22  ;;  %v2544_v24 = vmul.f32 -1.442695, %v253_v22 }
  0xef   :  { %3070 = vpow2.f32 %v2544_v24 }
  0xf7   :  { %v3069_v23 = vpop.eup %3068 }
  0xf8   :  { %263 = vrot.lane.b32.xlu0 %v3069_v23, %s3185_s3 }
  0xf9   :  { %v3071_v25 = vpop.eup %3070 }
  0xfa   :  { %v257_v26 = vadd.f32 1.0, %v3071_v25 }
  0xfc   :  { %3072 = vrcp.f32 %v257_v26 }
 0x106   :  { %v3073_v27 = vpop.eup %3072 }
 0x107   :  { %v261_v30 = vmul.f32 0.0, %v3073_v27 }
 0x16a   :  { %v264_v28 = vpop.permute.xlu0 %263 }
 0x16b   :  { %v266_v29 = vmul.f32 %v3073_v27, %v264_v28 }
 0x16d   :  { %268 = vrot.lane.b32.xlu0 %v266_v29, %s3186_s26 }
 0x1df   :  { %v269_v31 = vpop.permute.xlu0 %268 }
 0x1e0   :  { %v271_v32 = vadd.f32 %v269_v31, %v261_v30  ;;  %v585_v31 = vld [vmem:[#allocation2 + $0x10] sm:$0xf] }
 0x1e2   :  { %3074 = vtanh.f32 %v271_v32 }
 0x1ec   :  { %v3075_v33 = vpop.eup %3074 }
 0x1ed   :  { %274 = vrot.lane.b32.xlu1 %v3075_v33, %s3187_s27 }
 0x25f   :  { %v275_v34 = vpop.permute.xlu1 %274 }
 0x260   :  { %v277_v35 = vmul.f32 %v3073_v27, %v275_v34 }
 0x262   :  { %281 = vrot.lane.b32.xlu1 %v277_v35, %s3188_s28 }
 0x2d4   :  { %v282_v36 = vpop.permute.xlu1 %281 }
 0x2d5   :  { %2782 = vmatmul.mubr.msk.f32.vlgmr.msra.gmra.mrb[4].mxu1 %vm179_vm4, %v282_v36 }
 0x2d6   :  { %2871 = vmatpush3.bf16.msra.mxu1 %v3312_v7  ;;  %2795 = vmatprep.mubr.msk.f32.mxu1 %vm3183_vm2, %v3947_v9 }
 0x2d7   :  { %2875 = vmatprep.subr.bf16.mxu1 %v3949_v8 }
 0x3a8   :  { %v351_v38 = vpop.f32.mrb[4].mxu1 }
 0x3a9   :  { %v355_v39 = vadd.f32 %v351_v38, %v279_v37  ;;  %v2783_v40 = vpop.f32.mrb[5].mxu1 }
 0x3ab   :  { %3076 = vtanh.f32 %v355_v39  ;;  %v2546_v42 = vmul.f32 -1.442695, %v355_v39 }
 0x3ad   :  { %3078 = vpow2.f32 %v2546_v42 }
 0x3b5   :  { %v3077_v41 = vpop.eup %3076 }
 0x3b6   :  { %365 = vrot.lane.b32.xlu0 %v3077_v41, %s3185_s3 }
 0x3b7   :  { %v3079_v43 = vpop.eup %3078 }
 0x3b8   :  { %v359_v44 = vadd.f32 1.0, %v3079_v43 }
 0x3ba   :  { %3080 = vrcp.f32 %v359_v44 }
 0x3c4   :  { %v3081_v45 = vpop.eup %3080 }
 0x3c5   :  { %v363_v48 = vmul.f32 %v3081_v45, %v271_v32 }
 0x428   :  { %v366_v46 = vpop.permute.xlu0 %365 }
 0x429   :  { %v368_v47 = vmul.f32 %v3081_v45, %v366_v46 }
 0x42b   :  { %370 = vrot.lane.b32.xlu1 %v368_v47, %s3186_s26 }
 0x49d   :  { %v371_v49 = vpop.permute.xlu1 %370 }
 0x49e   :  { %v373_v50 = vadd.f32 %v371_v49, %v363_v48  ;;  %v687_v49 = vld [vmem:[#allocation2 + $0x14] sm:$0xf] }
 0x4a0   :  { %3082 = vtanh.f32 %v373_v50 }
 0x4aa   :  { %v3083_v51 = vpop.eup %3082 }
 0x4ab   :  { %376 = vrot.lane.b32.xlu0 %v3083_v51, %s3187_s27 }
 0x51d   :  { %v377_v52 = vpop.permute.xlu0 %376 }
 0x51e   :  { %v379_v53 = vmul.f32 %v3081_v45, %v377_v52 }
 0x520   :  { %383 = vrot.lane.b32.xlu1 %v379_v53, %s3188_s28 }
 0x592   :  { %v384_v54 = vpop.permute.xlu1 %383 }
 0x593   :  { %2789 = vmatmul.mubr.msk.f32.vlgmr.msra.gmra.mrb[2].mxu0 %vm179_vm4, %v384_v54 }
 0x594   :  { %2874 = vmatpush3.bf16.msra.mxu0 %v3312_v7  ;;  %2802 = vmatprep.mubr.msk.f32.mxu0 %vm3183_vm2, %v3947_v9 }
 0x595   :  { %2878 = vmatprep.subr.bf16.mxu0 %v3949_v8 }
 0x666   :  { %v453_v56 = vpop.f32.mrb[2].mxu0 }
 0x667   :  { %v457_v57 = vadd.f32 %v453_v56, %v381_v55  ;;  %v2790_v58 = vpop.f32.mrb[3].mxu0 }
 0x669   :  { %3084 = vtanh.f32 %v457_v57  ;;  %v2548_v60 = vmul.f32 -1.442695, %v457_v57 }
 0x66b   :  { %3086 = vpow2.f32 %v2548_v60 }
 0x673   :  { %v3085_v59 = vpop.eup %3084 }
 0x674   :  { %467 = vrot.lane.b32.xlu0 %v3085_v59, %s3185_s3 }
 0x675   :  { %v3087_v61 = vpop.eup %3086 }
 0x676   :  { %v461_v62 = vadd.f32 1.0, %v3087_v61 }
 0x678   :  { %3088 = vrcp.f32 %v461_v62 }
 0x682   :  { %v3089_v63 = vpop.eup %3088 }
 0x683   :  { %v465_v2 = vmul.f32 %v3089_v63, %v373_v50 }
 0x6e6   :  { %v468_v0 = vpop.permute.xlu0 %467 }
 0x6e7   :  { %v470_v1 = vmul.f32 %v3089_v63, %v468_v0 }
 0x6e9   :  { %472 = vrot.lane.b32.xlu1 %v470_v1, %s3186_s26 }
 0x75b   :  { %v473_v3 = vpop.permute.xlu1 %472 }
 0x75c   :  { %v475_v4 = vadd.f32 %v473_v3, %v465_v2  ;;  %v789_v2 = vld [vmem:[#allocation2 + $0x18] sm:$0xf] }
 0x75e   :  { %3090 = vtanh.f32 %v475_v4 }
 0x768   :  { %v3091_v6 = vpop.eup %3090 }
 0x769   :  { %478 = vrot.lane.b32.xlu0 %v3091_v6, %s3187_s27 }
 0x7db   :  { %v479_v10 = vpop.permute.xlu0 %478 }
 0x7dc   :  { %v481_v11 = vmul.f32 %v3089_v63, %v479_v10 }
 0x7de   :  { %485 = vrot.lane.b32.xlu1 %v481_v11, %s3188_s28 }
 0x850   :  { %v486_v12 = vpop.permute.xlu1 %485 }
 0x851   :  { %2796 = vmatmul.mubr.msk.f32.vlgmr.msra.gmra.mrb[6].mxu1 %vm179_vm4, %v486_v12 }
 0x852   :  { %2877 = vmatpush3.bf16.msra.mxu1 %v3312_v7  ;;  %2809 = vmatprep.mubr.msk.f32.mxu1 %vm3183_vm2, %v3947_v9 }
 0x853   :  { %2881 = vmatprep.subr.bf16.mxu1 %v3949_v8 }
 0x924   :  { %v555_v14 = vpop.f32.mrb[6].mxu1 }
 0x925   :  { %v559_v15 = vadd.f32 %v555_v14, %v483_v13  ;;  %v2797_v16 = vpop.f32.mrb[7].mxu1 }
 0x927   :  { %3092 = vtanh.f32 %v559_v15  ;;  %v2550_v18 = vmul.f32 -1.442695, %v559_v15 }
 0x929   :  { %3094 = vpow2.f32 %v2550_v18 }
 0x931   :  { %v3093_v17 = vpop.eup %3092 }
 0x932   :  { %569 = vrot.lane.b32.xlu0 %v3093_v17, %s3185_s3 }
 0x933   :  { %v3095_v19 = vpop.eup %3094 }
 0x934   :  { %v563_v20 = vadd.f32 1.0, %v3095_v19 }
 0x936   :  { %3096 = vrcp.f32 %v563_v20 }
 0x940   :  { %v3097_v21 = vpop.eup %3096 }
 0x941   :  { %v567_v24 = vmul.f32 %v3097_v21, %v475_v4 }
 0x9a4   :  { %v570_v22 = vpop.permute.xlu0 %569 }
 0x9a5   :  { %v572_v23 = vmul.f32 %v3097_v21, %v570_v22 }
 0x9a7   :  { %574 = vrot.lane.b32.xlu1 %v572_v23, %s3186_s26 }
 0xa19   :  { %v575_v25 = vpop.permute.xlu1 %574 }
 0xa1a   :  { %v577_v26 = vadd.f32 %v575_v25, %v567_v24  ;;  %v891_v24 = vld [vmem:[#allocation2 + $0x1c] sm:$0xf] }
 0xa1c   :  { %3098 = vtanh.f32 %v577_v26 }
 0xa26   :  { %v3099_v27 = vpop.eup %3098 }
 0xa27   :  { %580 = vrot.lane.b32.xlu0 %v3099_v27, %s3187_s27 }
 0xa99   :  { %v581_v28 = vpop.permute.xlu0 %580 }
 0xa9a   :  { %v583_v29 = vmul.f32 %v3097_v21, %v581_v28 }
 0xa9c   :  { %587 = vrot.lane.b32.xlu1 %v583_v29, %s3188_s28 }
 0xb0e   :  { %v588_v30 = vpop.permute.xlu1 %587 }
 0xb0f   :  { %2803 = vmatmul.mubr.msk.f32.vlgmr.msra.gmra.mrb[4].mxu0 %vm179_vm4, %v588_v30 }
 0xb10   :  { %2880 = vmatpush3.bf16.msra.mxu0 %v3312_v7  ;;  %2816 = vmatprep.mubr.msk.f32.mxu0 %vm3183_vm2, %v3947_v9 }
 0xb11   :  { %2826 = vmatprep.subr.mxu0 %v3947_v9 }
 0xbe2   :  { %v657_v32 = vpop.f32.mrb[4].mxu0 }
 0xbe3   :  { %v661_v33 = vadd.f32 %v657_v32, %v585_v31  ;;  %v2804_v34 = vpop.f32.mrb[5].mxu0 }
 0xbe4   :  { %v993_v34 = vrot.slane %v3305_v5, 4  ;;  %v1086_v5 = vld [vmem:[%s3934_s7 + $0x8] sm:$0xff] }
 0xbe5   :  { %3100 = vtanh.f32 %v661_v33  ;;  %v2552_v36 = vmul.f32 -1.442695, %v661_v33 }
 0xbe7   :  { %3102 = vpow2.f32 %v2552_v36  ;;  %v992_v36 = vld [vmem:[%s3931_s4] sm:$0x3] }
 0xbef   :  { %v3101_v35 = vpop.eup %3100 }
 0xbf0   :  { %671 = vrot.lane.b32.xlu0 %v3101_v35, %s3185_s3 }
 0xbf1   :  { %v3103_v37 = vpop.eup %3102 }
 0xbf2   :  { %v665_v38 = vadd.f32 1.0, %v3103_v37 }
 0xbf4   :  { %3104 = vrcp.f32 %v665_v38 }
 0xbfe   :  { %v3105_v39 = vpop.eup %3104 }
 0xbff   :  { %v669_v42 = vmul.f32 %v3105_v39, %v577_v26 }
 0xc62   :  { %v672_v40 = vpop.permute.xlu0 %671 }
 0xc63   :  { %v674_v41 = vmul.f32 %v3105_v39, %v672_v40  ;;  %v1090_v40 = vld [vmem:[%s3934_s7 + $0x28] sm:$0xff] }
 0xc65   :  { %676 = vrot.lane.b32.xlu1 %v674_v41, %s3186_s26  ;;  %v1088_v41 = vld [vmem:[%s3934_s7 + $0x18] sm:$0xff] }
 0xcd7   :  { %v677_v43 = vpop.permute.xlu1 %676 }
 0xcd8   :  { %v679_v44 = vadd.f32 %v677_v43, %v669_v42  ;;  %v2884_v42 = vpack.c.bf16 %v1090_v40, %v1086_v5  ;;  %v1092_v43 = vld [vmem:[%s3934_s7 + $0x38] sm:$0xff]  ;;  %v1561_v5 = vld [vmem:[%s3936_s9 + $0x28] sm:$0xff] }
 0xcda   :  { %3106 = vtanh.f32 %v679_v44 }
 0xce4   :  { %v3107_v45 = vpop.eup %3106 }
 0xce5   :  { %682 = vrot.lane.b32.xlu0 %v3107_v45, %s3187_s27  ;;  %v1089_v45 = vld [vmem:[%s3934_s7 + $0x20] sm:$0xff] }
 0xd57   :  { %v683_v46 = vpop.permute.xlu0 %682 }
 0xd58   :  { %v685_v47 = vmul.f32 %v3105_v39, %v683_v46  ;;  %v2888_v46 = vpack.c.bf16 %v1092_v43, %v1088_v41  ;;  %v1593_v43 = vld [vmem:[%s3936_s9 + $0x128] sm:$0xff] }
 0xd5a   :  { %689 = vrot.lane.b32.xlu1 %v685_v47, %s3188_s28 }
 0xdcc   :  { %v690_v48 = vpop.permute.xlu1 %689 }
 0xdcd   :  { %2810 = vmatmul.mubr.msk.f32.vlgmr.msra.gmra.mrb[8].mxu1 %vm179_vm4, %v690_v48  ;;  %v1087_v48 = vld [vmem:[%s3934_s7 + $0x10] sm:$0xff] }
 0xdce   :  { %2883 = vmatpush3.bf16.msra.mxu1 %v3312_v7  ;;  %2823 = vmatprep.mubr.msk.f32.mxu1 %vm3183_vm2, %v3947_v9 }
 0xdcf   :  { %2885 = vmatprep.subr.bf16.mxu1 %v2884_v42  ;;  %v1592_v42 = vld [vmem:[%s3936_s9 + $0x120] sm:$0xff] }
 0xea0   :  { %v759_v50 = vpop.f32.mrb[8].mxu1 }
 0xea1   :  { %v763_v51 = vadd.f32 %v759_v50, %v687_v49  ;;  %v2811_v52 = vpop.f32.mrb[9].mxu1  ;;  %v1091_v49 = vld [vmem:[%s3934_s7 + $0x30] sm:$0xff]  ;;  %v1078_v50 = vld [vmem:[%s3933_s6 + $0x8] sm:$0xff] }
 0xea2   :  { %v1082_v52 = vld [vmem:[%s3933_s6 + $0x28] sm:$0xff] }
 0xea3   :  { %3108 = vtanh.f32 %v763_v51  ;;  %v2554_v54 = vmul.f32 -1.442695, %v763_v51  ;;  %v2890_v51 = vpack.c.bf16 %v1091_v49, %v1087_v48  ;;  %v1611_v49 = vld [vmem:[%s3936_s9 + $0x1b8] sm:$0xff] }
 0xea5   :  { %3110 = vpow2.f32 %v2554_v54  ;;  %v1084_v54 = vld [vmem:[%s3933_s6 + $0x38] sm:$0xff] }
 0xead   :  { %v3109_v53 = vpop.eup %3108 }
 0xeae   :  { %773 = vrot.lane.b32.xlu0 %v3109_v53, %s3185_s3  ;;  %v1080_v53 = vld [vmem:[%s3933_s6 + $0x18] sm:$0xff] }
 0xeaf   :  { %v3111_v55 = vpop.eup %3110 }
 0xeb0   :  { %v767_v56 = vadd.f32 1.0, %v3111_v55  ;;  %v2892_v55 = vpack.c.bf16 %v1082_v52, %v1078_v50  ;;  %v1562_v50 = vld [vmem:[%s3936_s9 + $0x30] sm:$0xff] }
 0xeb2   :  { %3112 = vrcp.f32 %v767_v56  ;;  %v2896_v56 = vpack.c.bf16 %v1084_v54, %v1080_v53  ;;  %v1594_v54 = vld [vmem:[%s3936_s9 + $0x130] sm:$0xff] }
 0xebc   :  { %v3113_v57 = vpop.eup %3112 }
 0xebd   :  { %v771_v7 = vmul.f32 %v3113_v57, %v679_v44  ;;  %v1085_v44 = vld [vmem:[%s3934_s7] sm:$0xff] }
 0xebe   :  { %v2886_v47 = vpack.c.bf16 %v1089_v45, %v1085_v44  ;;  %v3573_v44 = vpack.c.bf16 %v1593_v43, %v1592_v42  ;;  %v1578_v45 = vld [vmem:[%s3936_s9 + $0xb0] sm:$0xff]  ;;  %v1587_v43 = vld [vmem:[%s3936_s9 + $0xf8] sm:$0xff] }
 0xebf   :  { %v1586_v42 = vld [vmem:[%s3936_s9 + $0xf0] sm:$0xff] }
 0xf20   :  { %v774_v58 = vpop.permute.xlu0 %773 }
 0xf21   :  { %v776_v59 = vmul.f32 %v3113_v57, %v774_v58 }
 0xf23   :  { %778 = vrot.lane.b32.xlu1 %v776_v59, %s3186_s26 }
 0xf95   :  { %v779_v60 = vpop.permute.xlu1 %778 }
 0xf96   :  { %v781_v61 = vadd.f32 %v779_v60, %v771_v7 }
 0xf98   :  { %3114 = vtanh.f32 %v781_v61 }
 0xfa2   :  { %v3115_v62 = vpop.eup %3114 }
 0xfa3   :  { %784 = vrot.lane.b32.xlu0 %v3115_v62, %s3187_s27  ;;  %v1081_v62 = vld [vmem:[%s3933_s6 + $0x20] sm:$0xff] }
0x1015   :  { %v785_v63 = vpop.permute.xlu0 %784 }
0x1016   :  { %v787_v0 = vmul.f32 %v3113_v57, %v785_v63  ;;  %v1079_v63 = vld [vmem:[%s3933_s6 + $0x10] sm:$0xff] }
0x1018   :  { %791 = vrot.lane.b32.xlu1 %v787_v0, %s3188_s28  ;;  %v1083_v0 = vld [vmem:[%s3933_s6 + $0x30] sm:$0xff] }
0x108a   :  { %v792_v1 = vpop.permute.xlu1 %791 }
0x108b   :  { %2817 = vmatmul.mubr.msk.f32.vlgmr.msra.gmra.mrb[6].mxu0 %vm179_vm4, %v792_v1 }
0x108c   :  { %2828 = vmatprep.mubr.msk.f32.mxu0 %vm3183_vm2, %v3947_v9  ;;  %2827 = vmatpush3.msk.msra.mxu0 %vm82_vm0, %v992_v36  ;;  %v1608_v36 = vld [vmem:[%s3936_s9 + $0x1a0] sm:$0xff] }
0x108d   :  { %2889 = vmatprep.subr.bf16.mxu0 %v2888_v46  ;;  %v1579_v46 = vld [vmem:[%s3936_s9 + $0xb8] sm:$0xff] }
0x108e   :  { %v3587_v48 = vpack.c.bf16 %v1579_v46, %v1578_v45  ;;  %v3725_v46 = vpack.c.bf16 %v1587_v43, %v1586_v42 }
0x108f   :  { %2829 = vmatmul.mubr.msk.f32.vlgmr.msra.gmra.mrb[8].mxu0 %vm69_vm1, %v993_v34  ;;  %v1576_v34 = vld [vmem:[%s3936_s9 + $0xa0] sm:$0xff] }
0x1090   :  { %1233 = vmatprep.mubr.f32.mxu0 %v3947_v9  ;;  %2891 = vmatpush1.bf16.msra.mxu0 %v2890_v51  ;;  %v1563_v51 = vld [vmem:[%s3936_s9 + $0x38] sm:$0xff]  ;;  %3961 = vst [vmem:[#allocation11_spill] sm:$0xff] %v3725_v46 }
0x1091   :  { %2897 = vmatprep.subr.bf16.mxu0 %v2896_v56  ;;  %v3600_v53 = vpack.c.bf16 %v1563_v51, %v1562_v50  ;;  %v1570_v50 = vld [vmem:[%s3936_s9 + $0x70] sm:$0xff] }
0x115e   :  { %v861_v3 = vpop.f32.mrb[6].mxu0 }
0x115f   :  { %v865_v4 = vadd.f32 %v861_v3, %v789_v2  ;;  %v2818_v6 = vpop.f32.mrb[7].mxu0  ;;  %v2898_v2 = vpack.c.bf16 %v1083_v0, %v1079_v63 }
0x1160   :  { %v1572_v6 = vld [vmem:[%s3936_s9 + $0x80] sm:$0xff] }
0x1161   :  { %3116 = vtanh.f32 %v865_v4  ;;  %v2556_v11 = vmul.f32 -1.442695, %v865_v4  ;;  %v2561_v4 = vld [vmem:[%s3932_s5] ss:$0 sm:$0xff] }
0x1162   :  { %v1065_v58 = vpop.f32.mrb[8].mxu0 }
0x1163   :  { %3118 = vpow2.f32 %v2556_v11  ;;  %v2830_v59 = vpop.f32.mrb[9].mxu0  ;;  %v1573_v11 = vld [vmem:[%s3936_s9 + $0x88] sm:$0xff] }
0x1164   :  { %v1612_v59 = vld [vmem:[%s3936_s9 + $0x1c0] sm:$0xff] }
0x116b   :  { %v3117_v10 = vpop.eup %3116 }
0x116c   :  { %875 = vrot.lane.b32.xlu0 %v3117_v10, %s3185_s3  ;;  %v1076_v10 = vadd.f32 %v2561_v4, %v1065_v58 }
0x116d   :  { %v3119_v12 = vpop.eup %3118 }
0x116e   :  { %v869_v13 = vadd.f32 1.0, %v3119_v12  ;;  %v1604_v12 = vld [vmem:[%s3936_s9 + $0x180] sm:$0xff] }
0x1170   :  { %3120 = vrcp.f32 %v869_v13  ;;  %v1605_v13 = vld [vmem:[%s3936_s9 + $0x188] sm:$0xff] }
0x117a   :  { %v3121_v14 = vpop.eup %3120 }
0x117b   :  { %v873_v17 = vmul.f32 %v3121_v14, %v781_v61  ;;  %v1077_v61 = vld [vmem:[%s3933_s6] sm:$0xff] }
0x117c   :  { %v2894_v1 = vpack.c.bf16 %v1081_v62, %v1077_v61  ;;  %v1564_v61 = vld [vmem:[%s3936_s9 + $0x40] sm:$0xff]  ;;  %v1565_v62 = vld [vmem:[%s3936_s9 + $0x48] sm:$0xff] }
0x117d   :  { %v3636_v0 = vpack.c.bf16 %v1565_v62, %v1564_v61  ;;  %v3946_v62 = vlaneseq }
0x11de   :  { %v876_v15 = vpop.permute.xlu0 %875 }
0x11df   :  { %v878_v16 = vmul.f32 %v3121_v14, %v876_v15  ;;  %v1557_v15 = vld [vmem:[%s3936_s9 + $0x8] sm:$0xff] }
0x11e1   :  { %880 = vrot.lane.b32.xlu1 %v878_v16, %s3186_s26  ;;  %v1588_v16 = vld [vmem:[%s3936_s9 + $0x100] sm:$0xff] }
0x1253   :  { %v881_v18 = vpop.permute.xlu1 %880 }
0x1254   :  { %v883_v19 = vadd.f32 %v881_v18, %v873_v17  ;;  %v1589_v17 = vld [vmem:[%s3936_s9 + $0x108] sm:$0xff]  ;;  %v3488_v18 = vpack.c.bf16 %v1573_v11, %v1572_v6  ;;  %v1582_v6 = vld [vmem:[%s3936_s9 + $0xd0] sm:$0xff] }
0x1255   :  { %v1614_v11 = vld [vmem:[%s3936_s9 + $0x1d0] sm:$0xff] }
0x1256   :  { %3122 = vtanh.f32 %v883_v19 }
0x1260   :  { %v3123_v20 = vpop.eup %3122 }
0x1261   :  { %886 = vrot.lane.b32.xlu0 %v3123_v20, %s3187_s27 }
0x12d3   :  { %v887_v21 = vpop.permute.xlu0 %886 }
0x12d4   :  { %v889_v22 = vmul.f32 %v3121_v14, %v887_v21  ;;  %v1556_v14 = vld [vmem:[%s3936_s9] sm:$0xff]  ;;  %v3496_v21 = vpack.c.bf16 %v1589_v17, %v1588_v16 }
0x12d5   :  { %v3494_v20 = vpack.c.bf16 %v1557_v15, %v1556_v14  ;;  %v1566_v14 = vld [vmem:[%s3936_s9 + $0x50] sm:$0xff]  ;;  %v1567_v15 = vld [vmem:[%s3936_s9 + $0x58] sm:$0xff] }
0x12d6   :  { %893 = vrot.lane.b32.xlu1 %v889_v22, %s3188_s28  ;;  %v1574_v22 = vld [vmem:[%s3936_s9 + $0x90] sm:$0xff]  ;;  %v3672_v17 = vpack.c.bf16 %v1567_v15, %v1566_v14  ;;  %v3190_v14 = vmov 1983009808  }
0x12d7   :  { %v1724_v15 = vunpack.c.l.s4 %v3190_v14 }
0x12d9   :  { %v1725_v42 = vunpack.c.0.s8 %v1724_v15 }
0x1348   :  { %v894_v23 = vpop.permute.xlu1 %893 }
0x1349   :  { %2824 = vmatmul.mubr.msk.f32.vlgmr.msra.gmra.mrb[10].mxu1 %vm179_vm4, %v894_v23  ;;  %v1575_v23 = vld [vmem:[%s3936_s9 + $0x98] sm:$0xff] }
0x134a   :  { %1162 = vmatprep.mubr.f32.mxu1 %v3947_v9  ;;  %2887 = vmatpush1.bf16.msra.mxu1 %v2886_v47  ;;  %v1610_v47 = vld [vmem:[%s3936_s9 + $0x1b0] sm:$0xff] }
0x134b   :  { %2893 = vmatprep.subr.bf16.mxu1 %v2892_v55  ;;  %v3598_v52 = vpack.c.bf16 %v1611_v49, %v1610_v47  ;;  %v1618_v47 = vld [vmem:[%s3936_s9 + $0x1f0] sm:$0xff]  ;;  %v1619_v49 = vld [vmem:[%s3936_s9 + $0x1f8] sm:$0xff] }
0x134c   :  { %v3737_v51 = vpack.c.bf16 %v1619_v49, %v1618_v47 }
0x134e   :  { %3962 = vst [vmem:[#allocation12_spill] sm:$0xff] %v3737_v51 }
0x141c   :  { %v963_v25 = vpop.f32.mrb[10].mxu1 }
0x141d   :  { %v967_v26 = vadd.f32 %v963_v25, %v891_v24  ;;  %v2825_v27 = vpop.f32.mrb[11].mxu1  ;;  %v1606_v24 = vld [vmem:[%s3936_s9 + $0x190] sm:$0xff]  ;;  %v3515_v25 = vpack.c.bf16 %v1575_v23, %v1574_v22  ;;  %v1599_v23 = vld [vmem:[%s3936_s9 + $0x158] sm:$0xff] }
0x141e   :  { %v1558_v27 = vld [vmem:[%s3936_s9 + $0x10] sm:$0xff] }
0x141f   :  { %3124 = vtanh.f32 %v967_v26  ;;  %v2558_v29 = vmul.f32 -1.442695, %v967_v26  ;;  %v1607_v26 = vld [vmem:[%s3936_s9 + $0x198] sm:$0xff]  ;;  %v1598_v22 = vld [vmem:[%s3936_s9 + $0x150] sm:$0xff] }
0x1421   :  { %3126 = vpow2.f32 %v2558_v29  ;;  %v3526_v29 = vpack.c.bf16 %v1607_v26, %v1606_v24  ;;  %v1584_v24 = vld [vmem:[%s3936_s9 + $0xe0] sm:$0xff]  ;;  %v3684_v26 = vpack.c.bf16 %v1599_v23, %v1598_v22 }
0x1429   :  { %v3125_v28 = vpop.eup %3124 }
0x142a   :  { %977 = vrot.lane.b32.xlu0 %v3125_v28, %s3185_s3  ;;  %v1559_v28 = vld [vmem:[%s3936_s9 + $0x18] sm:$0xff] }
0x142b   :  { %v3127_v30 = vpop.eup %3126 }
0x142c   :  { %v971_v31 = vadd.f32 1.0, %v3127_v30  ;;  %v3528_v30 = vpack.c.bf16 %v1559_v28, %v1558_v27  ;;  %v1585_v27 = vld [vmem:[%s3936_s9 + $0xe8] sm:$0xff]  ;;  %v1616_v28 = vld [vmem:[%s3936_s9 + $0x1e0] sm:$0xff] }
0x142e   :  { %3128 = vrcp.f32 %v971_v31  ;;  %v1590_v31 = vld [vmem:[%s3936_s9 + $0x110] sm:$0xff] }
0x1438   :  { %v3129_v32 = vpop.eup %3128 }
0x1439   :  { %v975_v37 = vmul.f32 %v3129_v32, %v883_v19  ;;  %v3490_v19 = vpack.c.bf16 %v1605_v13, %v1604_v12  ;;  %v1615_v13 = vld [vmem:[%s3936_s9 + $0x1d8] sm:$0xff] }
0x143a   :  { %v3670_v16 = vpack.c.bf16 %v1615_v13, %v1614_v11 }
0x149c   :  { %v978_v33 = vpop.permute.xlu0 %977 }
0x149d   :  { %v980_v35 = vmul.f32 %v3129_v32, %v978_v33 }
0x149f   :  { %982 = vrot.lane.b32.xlu1 %v980_v35, %s3186_s26  ;;  %v1577_v35 = vld [vmem:[%s3936_s9 + $0xa8] sm:$0xff] }
0x1511   :  { %v983_v38 = vpop.permute.xlu1 %982 }
0x1512   :  { %v985_v39 = vadd.f32 %v983_v38, %v975_v37  ;;  %v3551_v37 = vpack.c.bf16 %v1577_v35, %v1576_v34  ;;  %v1609_v38 = vld [vmem:[%s3936_s9 + $0x1a8] sm:$0xff]  ;;  %v1568_v35 = vld [vmem:[%s3936_s9 + $0x60] sm:$0xff] }
0x1513   :  { %v3562_v40 = vpack.c.bf16 %v1609_v38, %v1608_v36  ;;  %v1569_v36 = vld [vmem:[%s3936_s9 + $0x68] sm:$0xff]  ;;  %v1600_v38 = vld [vmem:[%s3936_s9 + $0x160] sm:$0xff] }
0x1514   :  { %3130 = vtanh.f32 %v985_v39  ;;  %v1560_v39 = vld [vmem:[%s3936_s9 + $0x20] sm:$0xff] }
0x1515   :  { %v3564_v41 = vpack.c.bf16 %v1561_v5, %v1560_v39  ;;  %v3710_v39 = vpack.c.bf16 %v1569_v36, %v1568_v35  ;;  %v1601_v5 = vld [vmem:[%s3936_s9 + $0x168] sm:$0xff]  ;;  %v1385_v36 = vld [vmem:[%s3935_s8] sm:$0xf] }
0x1516   :  { %v3723_v45 = vpack.c.bf16 %v1601_v5, %v1600_v38 }
0x151e   :  { %v3131_v57 = vpop.eup %3130 }
0x151f   :  { %988 = vrot.lane.b32.xlu0 %v3131_v57, %s3187_s27  ;;  %v1580_v57 = vld [vmem:[%s3936_s9 + $0xc0] sm:$0xff] }
0x1591   :  { %v989_v7 = vpop.permute.xlu0 %988 }
0x1592   :  { %v991_v60 = vmul.f32 %v3129_v32, %v989_v7  ;;  %v1591_v32 = vld [vmem:[%s3936_s9 + $0x118] sm:$0xff] }
0x1593   :  { %v3537_v33 = vpack.c.bf16 %v1591_v32, %v1590_v31  ;;  %v1617_v31 = vld [vmem:[%s3936_s9 + $0x1e8] sm:$0xff]  ;;  %v3696_v32 = vpack.c.bf16 %v1585_v27, %v1584_v24 }
0x1594   :  { %1094 = vrot.lane.b32.xlu1 %v991_v60, %s3188_s28  ;;  %v1613_v60 = vld [vmem:[%s3936_s9 + $0x1c8] sm:$0xff]  ;;  %v3698_v34 = vpack.c.bf16 %v1617_v31, %v1616_v28 }
0x1595   :  { %v3634_v63 = vpack.c.bf16 %v1613_v60, %v1612_v59  ;;  %v3189_v60 = vmov 1966171168  }
0x1596   :  { %v1628_v61 = vunpack.c.l.s4 %v3189_v60 }
0x1606   :  { %v3451_v3 = vpop.permute.xlu1 %1094 }
0x1607   :  { %3960 = vst [vmem:[#allocation10_spill] sm:$0xff] %v3451_v3  ;;  %2562 = vmatmul.mubr.msk.f32.vlgmr.msra.gmra.mrb[12].mxu1 %vm179_vm4, %v3451_v3  ;;  %2563 = vmatmul.mubr.msk.f32.vlgmr.msra.gmra.mrb[10].mxu0 %vm179_vm4, %v3451_v3  ;;  %2496 = vst.msk [vmem:[#allocation4] sm:$0xf] %vm2495_vm5, %v3451_v3 }
0x1608   :  { %2895 = vmatpush1.bf16.msra.mxu1 %v2894_v1  ;;  %2899 = vmatpush1.bf16.msra.mxu0 %v2898_v2 }
0x1609   :  { %1307 = vmatprep.mubr.f32.mxu1 %v3947_v9  ;;  %1378 = vmatprep.mubr.f32.mxu0 %v3947_v9 }
0x160a   :  { %2901 = vmatprep.subr.bf16.mxu1 %v2892_v55  ;;  %2905 = vmatprep.subr.bf16.mxu0 %v2896_v56  ;;  %v1595_v55 = vld [vmem:[%s3936_s9 + $0x138] sm:$0xff] }
0x160b   :  { %v3609_v56 = vpack.c.bf16 %v1595_v55, %v1594_v54  ;;  %v1571_v54 = vld [vmem:[%s3936_s9 + $0x78] sm:$0xff]  ;;  %v1602_v55 = vld [vmem:[%s3936_s9 + $0x170] sm:$0xff] }
0x160f   :  { %2564 = vmatmul.mubr.msk.f32.vlgmr.msra.gmra.mrb[12].mxu1 %vm179_vm4, %v1076_v10  ;;  %2565 = vmatmul.mubr.msk.f32.vlgmr.msra.gmra.mrb[10].mxu0 %vm179_vm4, %v1076_v10  ;;  %v1583_v10 = vld [vmem:[%s3936_s9 + $0xd8] sm:$0xff] }
0x1610   :  { %2903 = vmatpush1.bf16.msra.mxu1 %v2894_v1  ;;  %2907 = vmatpush1.bf16.msra.mxu0 %v2898_v2  ;;  %v1596_v1 = vld [vmem:[%s3936_s9 + $0x140] sm:$0xff]  ;;  %v1597_v2 = vld [vmem:[%s3936_s9 + $0x148] sm:$0xff]  ;;  %v3658_v12 = vpack.c.bf16 %v1583_v10, %v1582_v6  ;;  %v1629_v6 = vunpack.c.0.s8 %v1628_v61  ;;  %v1388_v10 = vshrl.u32 %v3946_v62, 7 }
0x1611   :  { %1478 = vmatprep.mubr.f32.mxu1 %v3947_v9  ;;  %1549 = vmatprep.mubr.f32.mxu0 %v3947_v9  ;;  %v3645_v4 = vpack.c.bf16 %v1597_v2, %v1596_v1 }
0x1612   :  { %2909 = vmatprep.subr.bf16.mxu1 %v3488_v18  ;;  %2941 = vmatprep.subr.bf16.mxu0 %v3490_v19  ;;  %v1632_v24 = vsub.s32 %v1629_v6, %v1388_v10  ;;  %v3761_v27 = vsub.s32 0, %v1388_v10  ;;  %v3767_v28 = vsub.s32 3, %v1388_v10  ;;  %v3776_v61 = vsub.s32 %v1725_v42, %v1388_v10 }
0x1613   :  { %2566 = vmatmul.mubr.msk.f32.vlgmr.msra.gmra.mrb[14].mxu1 %vm179_vm4, %v1065_v58  ;;  %2567 = vmatmul.mubr.msk.f32.vlgmr.msra.gmra.mrb[12].mxu0 %vm179_vm4, %v1065_v58  ;;  %v1581_v58 = vld [vmem:[%s3936_s9 + $0xc8] sm:$0xff] }
0x1614   :  { %2911 = vmatpush3.bf16.msra.mxu1 %v3494_v20  ;;  %2943 = vmatpush3.bf16.msra.mxu0 %v3496_v21  ;;  %v3623_v7 = vpack.c.bf16 %v1581_v58, %v1580_v57  ;;  %v1603_v57 = vld [vmem:[%s3936_s9 + $0x178] sm:$0xff]  ;;  %v3749_v58 = vpack.c.bf16 %v1571_v54, %v1570_v50  ;;  %v1390_v49 = vrot.slane %v1385_v36, %v3761_v27 }
0x1615   :  { %2913 = vmatprep.subr.bf16.mxu1 %v3515_v25  ;;  %2945 = vmatprep.subr.bf16.mxu0 %v3526_v29  ;;  %v3753_v59 = vpack.c.bf16 %v1603_v57, %v1602_v55  ;;  %v1402_v55 = vrot.slane %v1385_v36, %v3767_v28 }
0x1616   :  { %3963 = vst [vmem:[#allocation13_spill] sm:$0xff] %v3749_v58 }
0x1617   :  { %3964 = vst [vmem:[#allocation14_spill] sm:$0xff] %v3753_v59 }
0x1618   :  { %2915 = vmatpush3.bf16.msra.mxu1 %v3528_v30  ;;  %2947 = vmatpush3.bf16.msra.mxu0 %v3537_v33 }
0x1619   :  { %2917 = vmatprep.subr.bf16.mxu1 %v3551_v37  ;;  %2949 = vmatprep.subr.bf16.mxu0 %v3562_v40 }
0x161c   :  { %2919 = vmatpush3.bf16.msra.mxu1 %v3564_v41  ;;  %2951 = vmatpush3.bf16.msra.mxu0 %v3573_v44 }
0x161d   :  { %2921 = vmatprep.subr.bf16.mxu1 %v3587_v48  ;;  %2953 = vmatprep.subr.bf16.mxu0 %v3598_v52 }
0x1620   :  { %2923 = vmatpush3.bf16.msra.mxu1 %v3600_v53  ;;  %2955 = vmatpush3.bf16.msra.mxu0 %v3609_v56 }
0x1621   :  { %2925 = vmatprep.subr.bf16.mxu1 %v3623_v7  ;;  %2957 = vmatprep.subr.bf16.mxu0 %v3634_v63 }
0x1624   :  { %2927 = vmatpush3.bf16.msra.mxu1 %v3636_v0  ;;  %2959 = vmatpush3.bf16.msra.mxu0 %v3645_v4 }
0x1625   :  { %2929 = vmatprep.subr.bf16.mxu1 %v3658_v12  ;;  %2961 = vmatprep.subr.bf16.mxu0 %v3670_v16 }
0x1628   :  { %2931 = vmatpush3.bf16.msra.mxu1 %v3672_v17  ;;  %2963 = vmatpush3.bf16.msra.mxu0 %v3684_v26 }
0x1629   :  { %2933 = vmatprep.subr.bf16.mxu1 %v3696_v32  ;;  %2965 = vmatprep.subr.bf16.mxu0 %v3698_v34 }
0x162c   :  { %2935 = vmatpush3.bf16.msra.mxu1 %v3710_v39  ;;  %2967 = vmatpush3.bf16.msra.mxu0 %v3723_v45 }
0x162d   :  { %2937 = vmatprep.subr.bf16.mxu1 %v3725_v46  ;;  %2969 = vmatprep.subr.bf16.mxu0 %v3737_v51 }
0x1630   :  { %2939 = vmatpush3.bf16.msra.mxu1 %v3749_v58  ;;  %2971 = vmatpush3.bf16.msra.mxu0 %v3753_v59 }
0x1631   :  { %2973 = vmatprep.subr.bf16.mxu1 %v3488_v18  ;;  %3005 = vmatprep.subr.bf16.mxu0 %v3490_v19  ;;  %v3763_v18 = vsub.s32 2, %v1388_v10  ;;  %v3765_v19 = vsub.s32 1, %v1388_v10 }
0x1633   :  { %v1398_v50 = vrot.slane %v1385_v36, %v3763_v18  ;;  %v1394_v54 = vrot.slane %v1385_v36, %v3765_v19 }
0x16e2   :  { %v1309_v1 = vpop.f32.mrb[12].mxu1  ;;  %v1380_v2 = vpop.f32.mrb[10].mxu0 }
0x16e3   :  { %v1311_v11 = vpop.f32.mrb[13].mxu1  ;;  %v1382_v13 = vpop.f32.mrb[11].mxu0  ;;  %v1407_v62 = vadd.f32 %v1390_v49, %v1309_v1 }
0x16e4   :  { %v1410_v15 = vadd.f32 %v1402_v55, %v1382_v13 }
0x16e6   :  { %v1480_v22 = vpop.f32.mrb[14].mxu1  ;;  %v1551_v23 = vpop.f32.mrb[12].mxu0 }
0x16e7   :  { %v1482_v31 = vpop.f32.mrb[15].mxu1  ;;  %v1553_v35 = vpop.f32.mrb[13].mxu0 }
0x16e8   :  { %v1625_v38 = vcombine.low %v1480_v22, %v1482_v31  ;;  %v1626_v5 = vcombine.low %v1551_v23, %v1553_v35  ;;  %v1409_v22 = vadd.f32 %v1398_v50, %v1380_v2  ;;  %v1408_v23 = vadd.f32 %v1394_v54, %v1311_v11 }
0x16ea   :  { %v1633_v43 = vrot.slane %v1625_v38, %v1632_v24  ;;  %v1640_v47 = vrot.slane %v1626_v5, %v1632_v24 }
0x16ec   :  { %v1641_v57 = vcombine.low %v1633_v43, %v1640_v47  ;;  %v1642_v60 = vcombine.high %v1633_v43, %v1640_v47 }
0x16ee   :  { %v1649_v6 = vrot.slane %v1641_v57, %v1632_v24  ;;  %v1656_v14 = vrot.slane %v1642_v60, %v1632_v24 }
0x16f0   :  { %v1956_v31 = vcombine.high %v1649_v6, %v1649_v6  ;;  %v1957_v35 = vcombine.high %v1656_v14, %v1656_v14  ;;  %v1660_v38 = vrot.slane %v1649_v6, %v3761_v27  ;;  %v1664_v5 = vrot.slane %v1649_v6, %v3765_v19 }
0x16f1   :  { %v1676_v9 = vrot.slane %v1656_v14, %v3761_v27  ;;  %v1680_v36 = vrot.slane %v1656_v14, %v3765_v19  ;;  %v1668_v43 = vrot.slane %v1649_v6, %v3763_v18  ;;  %v1672_v10 = vrot.slane %v1649_v6, %v3767_v28 }
0x16f2   :  { %v1697_v42 = vsub.f32 %v1407_v62, %v1660_v38  ;;  %v1698_v24 = vsub.f32 %v1408_v23, %v1664_v5  ;;  %v1684_v1 = vrot.slane %v1656_v14, %v3763_v18  ;;  %v1688_v2 = vrot.slane %v1656_v14, %v3767_v28 }
0x16f3   :  { %v1701_v11 = vsub.f32 %v1407_v62, %v1676_v9  ;;  %v1702_v13 = vsub.f32 %v1408_v23, %v1680_v36  ;;  %v1699_v47 = vsub.f32 %v1409_v22, %v1668_v43  ;;  %v1700_v49 = vsub.f32 %v1410_v15, %v1672_v10 }
0x16f4   :  { %v1705_v50 = vmax.f32 %v1697_v42, 0.0  ;;  %v1706_v54 = vmax.f32 %v1698_v24, 0.0  ;;  %v1703_v55 = vsub.f32 %v1409_v22, %v1684_v1  ;;  %v1704_v57 = vsub.f32 %v1410_v15, %v1688_v2 }
0x16f5   :  { %v1709_v60 = vmax.f32 %v1701_v11, 0.0  ;;  %v1710_v8 = vmax.f32 %v1702_v13, 0.0  ;;  %v1707_v3 = vmax.f32 %v1699_v47, 0.0  ;;  %v1708_v59 = vmax.f32 %v1700_v49, 0.0 }
0x16f6   :  { %v1721_v58 = vcombine.low %v1705_v50, %v1706_v54  ;;  %v1711_v6 = vmax.f32 %v1703_v55, 0.0  ;;  %v1712_v38 = vmax.f32 %v1704_v57, 0.0  ;;  %v1961_v5 = vrot.slane %v1956_v31, %v3761_v27 }
0x16f7   :  { %v1738_v51 = vcombine.low %v1709_v60, %v1710_v8  ;;  %v1722_v46 = vcombine.low %v1707_v3, %v1708_v59  ;;  %v1965_v9 = vrot.slane %v1956_v31, %v3765_v19  ;;  %v1977_v14 = vrot.slane %v1957_v35, %v3761_v27 }
0x16f8   :  { %v1729_v36 = vrot.slane %v1721_v58, %v3776_v61  ;;  %v1739_v43 = vcombine.low %v1711_v6, %v1712_v38  ;;  %v1981_v10 = vrot.slane %v1957_v35, %v3765_v19  ;;  %v1998_v42 = vsub.f32 %v1407_v62, %v1961_v5 }
0x16f9   :  { %v1746_v24 = vrot.slane %v1738_v51, %v3776_v61  ;;  %v1736_v1 = vrot.slane %v1722_v46, %v3776_v61  ;;  %v1999_v2 = vsub.f32 %v1408_v23, %v1965_v9  ;;  %v2002_v11 = vsub.f32 %v1407_v62, %v1977_v14 }
0x16fa   :  { %v1753_v13 = vrot.slane %v1739_v43, %v3776_v61  ;;  %v2003_v8 = vsub.f32 %v1408_v23, %v1981_v10  ;;  %v2006_v3 = vmax.f32 %v1998_v42, 0.0  ;;  %v1969_v59 = vrot.slane %v1956_v31, %v3763_v18 }
0x16fb   :  { %v2569_v47 = vcombine.low %v1729_v36, %v1746_v24  ;;  %v2007_v27 = vmax.f32 %v1999_v2, 0.0  ;;  %v2010_v49 = vmax.f32 %v2002_v11, 0.0  ;;  %v1973_v58 = vrot.slane %v1956_v31, %v3767_v28 }
0x16fc   :  { %v2570_v50 = vcombine.low %v1736_v1, %v1753_v13  ;;  %v2011_v19 = vmax.f32 %v2003_v8, 0.0  ;;  %v1985_v54 = vrot.slane %v1957_v35, %v3763_v18  ;;  %v1989_v51 = vrot.slane %v1957_v35, %v3767_v28 }
0x16fd   :  { %v1769_v46 = vrot.slane %v2569_v47, %v3776_v61  ;;  %v2022_v62 = vcombine.low %v2006_v3, %v2007_v27  ;;  %v2000_v55 = vsub.f32 %v1409_v22, %v1969_v59  ;;  %v2001_v57 = vsub.f32 %v1410_v15, %v1973_v58 }
0x16fe   :  { %v1776_v23 = vrot.slane %v2570_v50, %v3776_v61  ;;  %v2039_v60 = vcombine.low %v2010_v49, %v2011_v19  ;;  %v2004_v6 = vsub.f32 %v1409_v22, %v1985_v54  ;;  %v2005_v38 = vsub.f32 %v1410_v15, %v1989_v51 }
0x16ff   :  { %v1777_v5 = vcombine.high %v1769_v46, %v1769_v46  ;;  %v2030_v9 = vrot.slane %v2022_v62, %v3776_v61  ;;  %v2008_v31 = vmax.f32 %v2000_v55, 0.0  ;;  %v2009_v14 = vmax.f32 %v2001_v57, 0.0 }
0x1700   :  { %v1778_v36 = vcombine.high %v1776_v23, %v1776_v23  ;;  %v2047_v18 = vrot.slane %v2039_v60, %v3776_v61  ;;  %v2012_v43 = vmax.f32 %v2004_v6, 0.0  ;;  %v2013_v28 = vmax.f32 %v2005_v38, 0.0 }
0x1701   :  { %1847 = vmatprep.mubr.f32.mxu1 %v1777_v5  ;;  %v2023_v35 = vcombine.low %v2008_v31, %v2009_v14 }
0x1702   :  { %1917 = vmatprep.mubr.f32.mxu0 %v1778_v36  ;;  %1848 = vmatmul.mubr.f32.vlgmr.msra.gmra.mrb[16].mxu1 %v1769_v46  ;;  %v2571_v10 = vcombine.high %v2030_v9, %v2047_v18  ;;  %v2040_v42 = vcombine.low %v2012_v43, %v2013_v28 }
0x1703   :  { %1918 = vmatmul.mubr.f32.vlgmr.msra.gmra.mrb[14].mxu0 %v1776_v23  ;;  %2975 = vmatpush3.bf16.msra.mxu1 %v3494_v20  ;;  %v2037_v22 = vrot.slane %v2023_v35, %v3776_v61 }
0x1704   :  { %3007 = vmatpush3.bf16.msra.mxu0 %v3496_v21  ;;  %v2064_v15 = vrot.slane %v2571_v10, %v3776_v61  ;;  %v2054_v24 = vrot.slane %v2040_v42, %v3776_v61  ;;  %2977 = vmatprep.subr.bf16.mxu1 %v3515_v25  ;;  %v3965_v21 = vld [vmem:[#allocation11_spill] sm:$0xff]  ;;  %v3966_v25 = vld [vmem:[#allocation12_spill] sm:$0xff] }
0x1705   :  { %3009 = vmatprep.subr.bf16.mxu0 %v3526_v29  ;;  %v2250_v29 = vld [vmem:[%s3938_s11] sm:$0xff] }
0x1706   :  { %v2072_v1 = vcombine.high %v2064_v15, %v2064_v15  ;;  %v2572_v2 = vcombine.high %v2037_v22, %v2054_v24 }
0x1707   :  { %2979 = vmatpush3.bf16.msra.mxu1 %v3528_v30  ;;  %v2251_v30 = vld [vmem:[%s3938_s11 + $0x8] sm:$0xff] }
0x1708   :  { %2142 = vmatprep.mubr.f32.mxu1 %v2072_v1  ;;  %v2071_v11 = vrot.slane %v2572_v2, %v3776_v61  ;;  %3011 = vmatpush3.bf16.msra.mxu0 %v3537_v33  ;;  %v3967_v33 = vld [vmem:[#allocation13_spill] sm:$0xff] }
0x1709   :  { %2981 = vmatprep.subr.bf16.mxu1 %v3551_v37  ;;  %3013 = vmatprep.subr.bf16.mxu0 %v3562_v40  ;;  %v3968_v37 = vld [vmem:[#allocation14_spill] sm:$0xff]  ;;  %v3043_v40 = vpack.c.bf16 %v2251_v30, %v2250_v29 }
0x170a   :  { %v2073_v20 = vcombine.high %v2071_v11, %v2071_v11 }
0x170b   :  { %2983 = vmatpush3.bf16.msra.mxu1 %v3564_v41  ;;  %v3969_v41 = vmov 0.0|0.0  }
0x170c   :  { %2212 = vmatprep.mubr.f32.mxu0 %v2073_v20  ;;  %3015 = vmatpush3.bf16.msra.mxu0 %v3573_v44  ;;  %v3970_v44 = vmov 0.0  }
0x170d   :  { %2985 = vmatprep.subr.bf16.mxu1 %v3587_v48  ;;  %3017 = vmatprep.subr.bf16.mxu0 %v3598_v52  ;;  %v3971_v48 = vld [vmem:[#allocation10_spill] sm:$0xff]  ;;  %v2252_v52 = vld [vmem:[%s3939_s12] sm:$0xff] }
0x170f   :  { %2987 = vmatpush3.bf16.msra.mxu1 %v3600_v53  ;;  %v2253_v53 = vld [vmem:[%s3939_s12 + $0x8] sm:$0xff] }
0x1710   :  { %3019 = vmatpush3.bf16.msra.mxu0 %v3609_v56  ;;  %2989 = vmatprep.subr.bf16.mxu1 %v3623_v7  ;;  %v2254_v56 = vld [vmem:[%s3939_s12 + $0x10] sm:$0xff]  ;;  %v3037_v7 = vpack.c.bf16 %v2253_v53, %v2252_v52  ;;  %v2410_v52 = vld [vmem:[%s3941_s14 + $0x8] sm:$0xff] }
0x1711   :  { %3021 = vmatprep.subr.bf16.mxu0 %v3634_v63  ;;  %v2255_v63 = vld [vmem:[%s3939_s12 + $0x18] sm:$0xff]  ;;  %v2411_v53 = vld [vmem:[%s3941_s14 + $0x10] sm:$0xff] }
0x1713   :  { %2991 = vmatpush3.bf16.msra.mxu1 %v3636_v0  ;;  %v3040_v0 = vpack.c.bf16 %v2255_v63, %v2254_v56 }
0x1714   :  { %3023 = vmatpush3.bf16.msra.mxu0 %v3645_v4  ;;  %2993 = vmatprep.subr.bf16.mxu1 %v3658_v12 }
0x1715   :  { %3025 = vmatprep.subr.bf16.mxu0 %v3670_v16  ;;  %v2568_v16 = vld [vmem:[%s3937_s10] ss:$0 sm:$0xff] }
0x1717   :  { %2995 = vmatpush3.bf16.msra.mxu1 %v3672_v17 }
0x1718   :  { %3027 = vmatpush3.bf16.msra.mxu0 %v3684_v26  ;;  %2997 = vmatprep.subr.bf16.mxu1 %v3696_v32 }
0x1719   :  { %3029 = vmatprep.subr.bf16.mxu0 %v3698_v34 }
0x171b   :  { %2999 = vmatpush3.bf16.msra.mxu1 %v3710_v39 }
0x171c   :  { %3031 = vmatpush3.bf16.msra.mxu0 %v3723_v45  ;;  %3001 = vmatprep.subr.bf16.mxu1 %v3965_v21 }
0x171d   :  { %3033 = vmatprep.subr.bf16.mxu0 %v3966_v25 }
0x171f   :  { %3003 = vmatpush3.bf16.msra.mxu1 %v3967_v33 }
0x1720   :  { %3035 = vmatpush3.bf16.msra.mxu0 %v3968_v37  ;;  %3036 = vmatprep.subr.bf16.mxu1 %v3969_v41 }
0x1721   :  { %3042 = vmatprep.subr.bf16.mxu0 %v3969_v41 }
0x1722   :  { %2143 = vmatmul.mubr.f32.vlgmr.msra.gmra.mrb[18].mxu1 %v2064_v15 }
0x1723   :  { %2213 = vmatmul.mubr.f32.vlgmr.msra.gmra.mrb[16].mxu0 %v2071_v11  ;;  %2839 = vmatprep.mubr.msk.f32.mxu1 %vm3183_vm2, %v3970_v44 }
0x1724   :  { %3044 = vmatpush3.bf16.msra.mxu0 %v3043_v40  ;;  %2846 = vmatprep.mubr.msk.f32.mxu0 %vm3183_vm2, %v3970_v44 }
0x1725   :  { %3045 = vmatprep.subr.bf16.mxu0 %v3969_v41  ;;  %3038 = vmatpush3.bf16.msra.mxu1 %v3037_v7  ;;  %v2412_v7 = vld [vmem:[%s3941_s14 + $0x18] sm:$0xff] }
0x1726   :  { %3039 = vmatprep.subr.bf16.mxu1 %v3969_v41  ;;  %v3049_v63 = vpack.c.bf16 %v2412_v7, %v2411_v53 }
0x1727   :  { %2847 = vmatmul.mubr.msk.f32.vlgmr.msra.gmra.mrb[18].mxu0 %vm179_vm4, %v3971_v48  ;;  %v2409_v48 = vld [vmem:[%s3941_s14] sm:$0xff]  ;;  %s3191_s14 = smov [#allocation4]  }
0x1728   :  { %2857 = vmatprep.mubr.msk.f32.mxu0 %vm3183_vm2, %v3970_v44  ;;  %v3046_v56 = vpack.c.bf16 %v2410_v52, %v2409_v48  ;;  %s2516_s9 = sshll.u32 %s3191_s14, 4  ;;  %s2517_s9 = int_to_ptr.vmem [resolvable:$true] %s2516_s9 }
0x1729   :  { %3041 = vmatpush3.bf16.msra.mxu1 %v3040_v0  ;;  %s3134_s22 = scalar_lea.vmem %s2517_s9, 64  ;;  %p3139_p1 = scmp.lt.s32.totalorder %s2517_s9, %s2517_s9 }
0x172a   :  { %3047 = vmatpush3.bf16.msra.mxu0 %v3046_v56  ;;  %p3135_p0 = scmp.ne.s32.totalorder %s2517_s9, %s3134_s22  ;;  %p3140_p2 = scmp.lt.s32.totalorder %s3134_s22, %s3134_s22 }
0x172b   :  { %3048 = vmatprep.subr.bf16.mxu0 %v3969_v41 }
0x172c   :  { %p3141_p3 = por %p3140_p2, %p3139_p1 }
0x172e   :  { %3050 = vmatpush3.bf16.msra.mxu0 %v3049_v63  ;;  %p3142_p4 = pnand %p3141_p3, %p3135_p0 }
0x17d5   :  { %v2641_v4 = vpop.f32.mrb[16].mxu1 }
0x17d6   :  { %v2676_v12 = vpop.f32.mrb[14].mxu0  ;;  %v2642_v17 = vpop.f32.mrb[17].mxu1 }
0x17d7   :  { %v2643_v26 = vadd.f32 %v2642_v17, %v2641_v4  ;;  %v2677_v32 = vpop.f32.mrb[15].mxu0 }
0x17d8   :  { %v2678_v34 = vadd.f32 %v2677_v32, %v2676_v12  ;;  %v2575_v12 = vld [vmem:[%s3940_s13] ss:$0 sm:$0xff] }
0x17d9   :  { %v1850_v39 = vadd.f32 %v2643_v26, %v2568_v16 }
0x17db   :  { %v1920_v45 = vadd.f32 %v2678_v34, %v1850_v39 }
0x17dd   :  { %v1923_v13 = vmax.f32 %v1920_v45, 0.0 }
0x17df   :  { %v1931_v8 = vrot.slane %v1923_v13, %v3776_v61 }
0x17e1   :  { %v1932_v3 = vcombine.high %v1931_v8, %v1931_v8  ;;  %v1936_v59 = vsel %vm1935_vm6, %v1931_v8, -inf }
0x17e2   :  { %v1937_v47 = vrot.slane %v1936_v59, 4 }
0x17e3   :  { %v1943_v27 = vsel %vm1935_vm6, %v1932_v3, -inf }
0x17e4   :  { %v1938_v49 = vmax.f32 %v1936_v59, %v1937_v47  ;;  %v1944_v58 = vrot.slane %v1943_v27, 4 }
0x17e6   :  { %v1939_v50 = vrot.slane %v1938_v49, 2  ;;  %v1945_v19 = vmax.f32 %v1943_v27, %v1944_v58 }
0x17e8   :  { %v1940_v54 = vmax.f32 %v1938_v49, %v1939_v50  ;;  %v1946_v51 = vrot.slane %v1945_v19, 2 }
0x17ea   :  { %v1941_v46 = vrot.slane %v1940_v54, 1  ;;  %v1947_v62 = vmax.f32 %v1945_v19, %v1946_v51 }
0x17ec   :  { %v1948_v55 = vrot.slane %v1947_v62, 1  ;;  %v1942_v57 = vmax.f32 %v1940_v54, %v1941_v46 }
0x17ee   :  { %v1949_v23 = vmax.f32 %v1947_v62, %v1948_v55 }
0x17f0   :  { %v1953_v60 = vsel %vm1952_vm7, %v1949_v23, %v1942_v57 }
0x17f1   :  { %1955 = vst.msk [vmem:[#allocation3] sm:$0x3] %vm1935_vm6, %v1953_v60 }
0x17f5   :  { %v2711_v6 = vpop.f32.mrb[18].mxu1 }
0x17f6   :  { %v2746_v38 = vpop.f32.mrb[16].mxu0  ;;  %v2712_v5 = vpop.f32.mrb[19].mxu1 }
0x17f7   :  { %v2713_v9 = vadd.f32 %v2712_v5, %v2711_v6  ;;  %v2747_v31 = vpop.f32.mrb[17].mxu0 }
0x17f8   :  { %v2748_v14 = vadd.f32 %v2747_v31, %v2746_v38 }
0x17f9   :  { %v2145_v36 = vadd.f32 %v2713_v9, %v2568_v16 }
0x17fa   :  { %v2396_v18 = vpop.f32.mrb[18].mxu0 }
0x17fb   :  { %v2215_v43 = vadd.f32 %v2748_v14, %v2145_v36  ;;  %v2848_v28 = vpop.f32.mrb[19].mxu0 }
0x17fd   :  { %v2218_v35 = vmax.f32 %v2215_v43, 0.0 }
0x17ff   :  { %v2226_v10 = vrot.slane %v2218_v35, %v3776_v61 }
0x1801   :  { %v2227_v42 = vcombine.high %v2226_v10, %v2226_v10  ;;  %v2230_v22 = vsel %vm1935_vm6, %v2226_v10, -inf }
0x1802   :  { %v2231_v15 = vrot.slane %v2230_v22, 4 }
0x1803   :  { %v2237_v24 = vsel %vm1935_vm6, %v2227_v42, -inf }
0x1804   :  { %v2232_v1 = vmax.f32 %v2230_v22, %v2231_v15  ;;  %v2238_v2 = vrot.slane %v2237_v24, 4 }
0x1806   :  { %v2233_v11 = vrot.slane %v2232_v1, 2  ;;  %v2239_v20 = vmax.f32 %v2237_v24, %v2238_v2 }
0x1808   :  { %v2234_v21 = vmax.f32 %v2232_v1, %v2233_v11  ;;  %v2240_v25 = vrot.slane %v2239_v20, 2 }
0x180a   :  { %v2235_v29 = vrot.slane %v2234_v21, 1  ;;  %v2241_v30 = vmax.f32 %v2239_v20, %v2240_v25 }
0x180c   :  { %v2242_v33 = vrot.slane %v2241_v30, 1  ;;  %v2236_v37 = vmax.f32 %v2234_v21, %v2235_v29 }
0x180e   :  { %v2243_v40 = vmax.f32 %v2241_v30, %v2242_v33 }
0x1810   :  { %v2246_v44 = vsel %vm1952_vm7, %v2243_v40, %v2236_v37 }
0x1811   :  { %2248 = vst.msk [vmem:[#allocation3 + $0x2] sm:$0x3] %vm1935_vm6, %v2246_v44 }
0x1818   :  { %v2249_v61 = vld [vmem:[#allocation3] sm:$0xf] }
0x1819   :  { %2497 = vrot.lane.b32.xlu0 %v2249_v61, %s3186_s26  ;;  %2840 = vmatmul.mubr.msk.f32.vlgmr.msra.gmra.mrb[20].mxu1 %vm2256_vm8, %v2249_v61 }
0x188b   :  { %v2498_v0 = vpop.permute.xlu0 %2497 }
0x188c   :  { %2501 = vst.msk [vmem:[#allocation4] sm:$0xf] %vm2500_vm9, %v2498_v0 }
0x18ec   :  { %v2326_v4 = vpop.f32.mrb[20].mxu1 }
0x18ed   :  { %v2397_v16 = vadd.f32 %v2396_v18, %v2326_v4  ;;  %v2841_v17 = vpop.f32.mrb[21].mxu1 }
0x18ef   :  { %v2407_v26 = vadd.f32 %v2575_v12, %v2397_v16 }
0x18f1   :  { %v2408_v32 = vmax.f32 %v2407_v26, 0.0 }
0x18f3   :  { %2858 = vmatmul.mubr.msk.f32.vlgmr.msra.gmra.mrb[20].mxu0 %vm2256_vm8, %v2408_v32 }
0x18f4   :  { %3145 = shalt.err (!%p3142_p4)
}
0x18f5   :  { %s3146_s13 = scalar_lea.hbm %s3943_s16, 64 }
0x18f6   :  { %p3147_p5 = scmp.ne.s32.totalorder %s3943_s16, %s3146_s13  ;;  %p3150_p6 = scmp.lt.u32.totalorder %s3146_s13, %s3943_s16 }
0x18f8   :  { %p3152_p7 = pnand %p3150_p6, %p3147_p5 }
0x18fa   :  { %3155 = shalt.err (!%p3152_p7)
}
0x18fb   :  { %2519 = dma.vmem_to_hbm [thread:$0]  %s2517_s9, 64, %s3943_s16, [#allocation5]   ;;  %v2576_v41 = vld [vmem:[%s3942_s15] ss:$0 sm:$0xff]  ;;  %v3972_v59 = vlaneseq }
0x18fc   :  { %s3192_s27 = smov [#allocation6]  }
0x18fd   :  { %v2503_v47 = vand.u32 127, %v3972_v59  ;;  %s2526_s28 = sshll.u32 %s3192_s27, 4  ;;  %s2527_s28 = int_to_ptr.vmem [resolvable:$true] %s2526_s28 }
0x18fe   :  { %s3156_s16 = scalar_lea.vmem %s2527_s28, 64  ;;  %p3161_p9 = scmp.lt.s32.totalorder %s2527_s28, %s2527_s28 }
0x18ff   :  { %vm2504_vm10 = vcmp.lt.s32.totalorder %v2503_v47, 8  ;;  %p3157_p8 = scmp.ne.s32.totalorder %s2527_s28, %s3156_s16  ;;  %p3162_p10 = scmp.lt.s32.totalorder %s3156_s16, %s3156_s16 }
0x1901   :  { %p3163_p11 = por %p3162_p10, %p3161_p9 }
0x1903   :  { %p3164_p12 = pnand %p3163_p11, %p3157_p8 }
0x19c6   :  { %v2489_v34 = vpop.f32.mrb[20].mxu0 }
0x19c7   :  { %v2490_v39 = vadd.f32 %v2576_v41, %v2489_v34  ;;  %v2859_v45 = vpop.f32.mrb[21].mxu0 }
0x19c9   :  { %v2493_v13 = vmax.f32 %v2490_v39, 0.0 }
0x19cb   :  { %v2505_v8 = vmul.f32 0.5, %v2493_v13 }
0x19cd   :  { %v2506_v3 = vmul.f32 1.442695, %v2505_v8 }
0x19cf   :  { %3132 = vpow2.f32 %v2506_v3 }
0x19d9   :  { %v3133_v27 = vpop.eup %3132 }
0x19da   :  { %v2508_v49 = vsel %vm2504_vm10, %v2493_v13, %v3133_v27 }
0x19db   :  { %2509 = vst.msk [vmem:[#allocation6] sm:$0xf] %vm2495_vm5, %v2508_v49 }
0x19dc   :  { %3167 = shalt.err (!%p3164_p12)
}
0x19dd   :  { %s3168_s6 = scalar_lea.hbm %s3944_s17, 64 }
0x19de   :  { %p3169_p13 = scmp.ne.s32.totalorder %s3944_s17, %s3168_s6  ;;  %p3172_p0 = scmp.lt.u32.totalorder %s3168_s6, %s3944_s17 }
0x19e0   :  { %p3174_p1 = pnand %p3172_p0, %p3169_p13 }
0x19e2   :  { %3177 = shalt.err (!%p3174_p1)
}
0x19e3   :  { %2529 = dma.vmem_to_hbm [thread:$0]  %s2527_s28, 64, %s3944_s17, [#allocation7]  }
0x19e4   :  { %3178 = dma.done.wait [#allocation5], 64  }
0x19e5   :  { %3179 = vsyncadd [#allocation5], 4294967232 }
0x19e6   :  { %3180 = dma.done.wait [#allocation7], 64  }
0x19e7   :  { %3181 = vsyncadd [#allocation7], 4294967232 }
0x19e8   :  { %2536 = vsyncpa [#allocation5], 1 }
0x19e9   :  { %2537 = vsyncpa [#allocation7], 1 }

</bundles_post_ra>
